<compile_context>
chip_gen: v7x
topology: tpu7x:2x2x1
jax: 0.10.0
libtpu: 0.0.40
codegen_flags: <defaults>
</compile_context>

<pallas_src>
import functools

import jax
import jax.numpy as jnp
import numpy as np
from jax import lax
from jax.experimental import pallas as pl
from jax.experimental.pallas import tpu as pltpu


# --------------------------------------------------------------------------
# helpers
# --------------------------------------------------------------------------
def _pair(v):
    if isinstance(v, (tuple, list)):
        assert len(v) == 2
        return int(v[0]), int(v[1])
    return int(v), int(v)


def _concat_last(parts):
    return parts[0] if len(parts) == 1 else jnp.concatenate(parts, axis=-1)


def _tap_read(x_ref, base, kh, kw, *, sh, sw, dh, dw, tile_oh, ow):
    """Contiguous read of conv tap (kh, kw): (tile_oh, ow, C).

    x_ref is the phase-major (space-to-depth) image (sh*sw, Hs, Ws, C) with
    element [dy*sw+dx, y, x, c] == padded_image[y*sh+dy, x*sw+dx, c].
    Output row oh / col j needs original (oh*sh + kh*dh, j*sw + kw*dw), i.e.
    phase ((kh*dh)%sh, (kw*dw)%sw) at block (oh + kh*dh//sh, j + kw*dw//sw).
    """
    p = ((kh * dh) % sh) * sw + ((kw * dw) % sw)
    r0 = (kh * dh) // sh
    c0 = (kw * dw) // sw
    return x_ref[p, pl.ds(base + r0, tile_oh), c0:c0 + ow, :]


# --------------------------------------------------------------------------
# kernels
# --------------------------------------------------------------------------
def _conv_bn_mm_kernel(x_ref, w_ref, scale_ref, bias_ref, o_ref, *,
                       G, Cin_g, Cout_g, KH, KW, sh, sw, dh, dw,
                       tile_oh, ow, im2col):
    """Grouped / dense conv: single im2col MXU matmul per tile (per group)
    when the contraction stays lane-aligned, else per-tap matmul accumulation."""
    base = pl.program_id(1) * tile_oh
    if tile_oh % 8 == 0:
        base = pl.multiple_of(base, 8)
    rows = tile_oh * ow
    n_taps = KH * KW

    taps = []
    for kh in range(KH):
        for kw in range(KW):
            taps.append(_tap_read(x_ref, base, kh, kw, sh=sh, sw=sw,
                                  dh=dh, dw=dw, tile_oh=tile_oh, ow=ow))

    outs = []
    for g in range(G):
        lo = g * Cin_g
        if im2col:
            patches = _concat_last(
                [tp[:, :, lo:lo + Cin_g].reshape(rows, Cin_g) for tp in taps])
            y_g = jnp.dot(patches, w_ref[g].reshape(n_taps * Cin_g, Cout_g),
                          preferred_element_type=jnp.float32)
        else:
            # TODO(synk): small / unaligned Cin_g underfeeds the MXU; pad the
            # contraction dim to a lane multiple if this path ever gets hot
            # (only conv1 with Cin=3 hits it in ShuffleNetV2).
            y_g = jnp.zeros((rows, Cout_g), jnp.float32)
            for k in range(n_taps):
                pg = taps[k][:, :, lo:lo + Cin_g].reshape(rows, Cin_g)
                y_g = y_g + jnp.dot(pg, w_ref[g, k],
                                    preferred_element_type=jnp.float32)
        outs.append(y_g)

    y = _concat_last(outs)                          # (rows, Cout) f32
    y = y * scale_ref[...] + bias_ref[...]          # fused BN affine (f32)
    o_ref[...] = y.reshape(tile_oh, ow, G * Cout_g).astype(o_ref.dtype)


def _conv_bn_dw_kernel(x_ref, w_ref, scale_ref, bias_ref, o_ref, *,
                       C, KH, KW, sh, sw, dh, dw, tile_oh, ow):
    """Depthwise conv: per-tap VPU FMA, channels on the lane axis.
    bf16 multiply (bf16 VALU on v6e/v7x), f32 accumulation, f32 BN affine."""
    base = pl.program_id(1) * tile_oh
    if tile_oh % 8 == 0:
        base = pl.multiple_of(base, 8)
    acc = jnp.zeros((tile_oh, ow, C), jnp.float32)
    for kh in range(KH):
        for kw in range(KW):
            tap = _tap_read(x_ref, base, kh, kw, sh=sh, sw=sw, dh=dh, dw=dw,
                            tile_oh=tile_oh, ow=ow)        # (tile_oh, ow, C) bf16
            acc = acc + (tap * w_ref[kh * KW + kw, :]).astype(jnp.float32)
    o_ref[...] = (acc * scale_ref[...] + bias_ref[...]).astype(o_ref.dtype)


# --------------------------------------------------------------------------
# wrapper
# --------------------------------------------------------------------------
def _pick_tile_oh(OH, OW, Cin, Cout, n_taps, im2col, out_bytes,
                  budget=8 << 20):
    """Largest output-row tile whose per-tile working set fits the budget
    (double-buffered output block + matmul / accumulator intermediates)."""
    patch_c = n_taps * Cin if im2col else Cin
    per_row = OW * (2 * Cout * out_bytes     # double-buffered output block
                    + 2 * Cout * 4           # f32 matmul result / BN temp
                    + patch_c * 2            # bf16 im2col patches / tap
                    + Cout * 4)              # f32 depthwise accumulator
    t = int(budget // max(per_row, 1))
    if t >= OH:
        return OH
    return max(8, min((t // 8) * 8, OH))


def conv_bn_nhwc(x_nhwc, weight, gamma, beta, running_mean, running_var, *,
                 stride=1, padding=0, dilation=1, groups=1, eps=1e-5,
                 tile_oh=None, out_dtype=jnp.bfloat16):
    """Fused Conv2d(bias=False) + BatchNorm2d(eval) forward, NHWC in / out.

    x_nhwc: (N, H, W, Cin); weight: (Cout, Cin // groups, KH, KW)  (OIHW)
    gamma / beta / running_mean / running_var: (Cout,). Returns (N, OH, OW, Cout).
    """
    N, H, W, Cin = map(int, x_nhwc.shape)
    Cout, Cin_g, KH, KW = map(int, weight.shape)
    G = int(groups)
    assert Cin == Cin_g * G and Cout % G == 0
    Cout_g = Cout // G

    sh, sw = _pair(stride)
    ph, pw = _pair(padding)
    dh, dw = _pair(dilation)

    OH = (H + 2 * ph - dh * (KH - 1) - 1) // sh + 1
    OW = (W + 2 * pw - dw * (KW - 1) - 1) // sw + 1
    assert OH > 0 and OW > 0
    n_taps = KH * KW
    depthwise = (G > 1 and G == Cin and Cout == Cin and Cin_g == 1)
    im2col = (n_taps == 1) or (Cin_g % 128 == 0)
    out_bytes = jnp.dtype(out_dtype).itemsize

    # ---- output-row tiling ----
    if tile_oh is None:
        tile_OH = _pick_tile_oh(OH, OW, Cin, Cout, n_taps, im2col, out_bytes)
    else:
        tile_OH = max(1, min(int(tile_oh), OH))
    num_t = -(-OH // tile_OH)                        # cdiv
    OH_pad = num_t * tile_OH

    # ---- pad + space-to-depth (phase-major) input, bf16 ----
    P = sh * sw
    Hs = OH_pad + ((KH - 1) * dh) // sh              # rows in s2d space
    Ws = OW + ((KW - 1) * dw) // sw
    Hp, Wp = Hs * sh, Ws * sw                        # padded image rows / cols
    xb = x_nhwc.astype(jnp.bfloat16)
    x_p = jnp.pad(xb, ((0, 0),
                       (ph, max(0, Hp - H - ph)),
                       (pw, max(0, Wp - W - pw)),
                       (0, 0)))[:, :Hp, :Wp]
    if P == 1:
        x_ph = x_p.reshape(N, 1, Hs, Ws, Cin)        # free (metadata only)
    else:
        # one HBM pass, stride>1 layers only: makes every tap read contiguous
        x_ph = (x_p.reshape(N, Hs, sh, Ws, sw, Cin)
                   .transpose(0, 2, 4, 1, 3, 5)
                   .reshape(N, P, Hs, Ws, Cin))

    # ---- weights (bf16) ----
    wb = weight.astype(jnp.bfloat16)
    if depthwise:
        w_k = wb.reshape(Cout, n_taps).T             # (KH*KW, C)
        kernel = functools.partial(_conv_bn_dw_kernel, C=Cout, KH=KH, KW=KW,
                                   sh=sh, sw=sw, dh=dh, dw=dw,
                                   tile_oh=tile_OH, ow=OW)
        w_spec = pl.BlockSpec((n_taps, Cout), lambda n, t: (0, 0))
    else:
        # (G, KH*KW, Cin_g, Cout_g), contraction index = (kh*KW + kw)*Cin_g + cin
        w_k = jnp.transpose(wb.reshape(G, Cout_g, Cin_g, KH, KW),
                            (0, 3, 4, 2, 1)).reshape(G, n_taps, Cin_g, Cout_g)
        kernel = functools.partial(_conv_bn_mm_kernel, G=G, Cin_g=Cin_g,
                                   Cout_g=Cout_g, KH=KH, KW=KW, sh=sh, sw=sw,
                                   dh=dh, dw=dw, tile_oh=tile_OH, ow=OW,
                                   im2col=im2col)
        w_spec = pl.BlockSpec((G, n_taps, Cin_g, Cout_g),
                              lambda n, t: (0, 0, 0, 0))

    # BatchNorm (eval) folded into per-channel scale / bias, f32.
    scale = gamma.astype(jnp.float32) / jnp.sqrt(
        running_var.astype(jnp.float32) + eps)
    bias = beta.astype(jnp.float32) - running_mean.astype(jnp.float32) * scale
    scale_2d = scale.reshape(1, Cout)
    bias_2d = bias.reshape(1, Cout)

    # ---- specs: resident per-image input, row-tiled output ----
    x_spec = pl.BlockSpec((None, P, Hs, Ws, Cin),
                          lambda n, t: (n, 0, 0, 0, 0))
    sb_spec = pl.BlockSpec((1, Cout), lambda n, t: (0, 0))
    out_spec = pl.BlockSpec((None, tile_OH, OW, Cout),
                            lambda n, t: (n, t, 0, 0))   # partial last block masked

    flops = 2 * N * OH * OW * n_taps * Cin_g * Cout_g * G
    bytes_accessed = int(x_ph.size * 2 + w_k.size * 2 + 2 * Cout * 4
                         + N * OH * OW * Cout * out_bytes)

    # ---- VMEM accounting; raise the scoped limit only when needed ----
    patch_c = (n_taps * Cin) if im2col else Cin
    vmem_est = (2 * P * Hs * Ws * Cin * 2            # resident input, dbl-buffered
                + 2 * w_k.size * 2
                + 2 * tile_OH * OW * Cout * out_bytes
                + tile_OH * OW * (patch_c * 2 + 2 * Cout * 4)
                + (2 << 20))
    cp = dict(dimension_semantics=("parallel", "parallel"))
    if vmem_est > (12 << 20):
        cp["vmem_limit_bytes"] = int(min(max(vmem_est * 5 // 4, 16 << 20),
                                         64 << 20))

    out = pl.pallas_call(
        kernel,
        out_shape=jax.ShapeDtypeStruct((N, OH, OW, Cout), out_dtype),
        grid=(N, num_t),
        in_specs=[x_spec, w_spec, sb_spec, sb_spec],
        out_specs=out_spec,
        compiler_params=pltpu.CompilerParams(**cp),
        cost_estimate=pl.CostEstimate(flops=flops, transcendentals=0,
                                      bytes_accessed=bytes_accessed),
    )(x_ph, w_k, scale_2d, bias_2d)
    return out


def conv_bn(x_nchw, weight, gamma, beta, running_mean, running_var, *,
            stride=1, padding=0, dilation=1, groups=1, eps=1e-5,
            tile_oh=None, out_dtype=jnp.bfloat16):
    """NCHW wrapper matching the PyTorch ConvBn module.  Prefer conv_bn_nhwc
    with a persistent NHWC layout across the whole model so the NCHW<->NHWC
    transposes are paid once at the model boundary, not per layer."""
    x_nhwc = jnp.transpose(x_nchw, (0, 2, 3, 1))
    y = conv_bn_nhwc(x_nhwc, weight, gamma, beta, running_mean, running_var,
                     stride=stride, padding=padding, dilation=dilation,
                     groups=groups, eps=eps, tile_oh=tile_oh,
                     out_dtype=out_dtype)
    return jnp.transpose(y, (0, 3, 1, 2))


# --------------------------------------------------------------------------
# reference + tests
# --------------------------------------------------------------------------
def _reference(x, weight, gamma, beta, running_mean, running_var, *,
               stride, padding, dilation, groups, eps=1e-5):
    sh, sw = _pair(stride)
    ph, pw = _pair(padding)
    dh, dw = _pair(dilation)
    # Matches the kernel's bf16 input/weight rounding with f32 accumulation.
    xb = x.astype(jnp.bfloat16).astype(jnp.float32)
    wb = weight.astype(jnp.bfloat16).astype(jnp.float32)
    y = lax.conv_general_dilated(
        xb, wb, window_strides=(sh, sw),
        padding=[(ph, ph), (pw, pw)], rhs_dilation=(dh, dw),
        dimension_numbers=('NCHW', 'OIHW', 'NCHW'),
        feature_group_count=groups, precision=lax.Precision.HIGHEST)
    scale = gamma / jnp.sqrt(running_var + eps)
    bias = beta - running_mean * scale
    return y * scale[None, :, None, None] + bias[None, :, None, None]


def _run_case(key, *, N, Cin, Cout, H, W, K, stride=1, padding=0, dilation=1,
              groups=1, tile_oh=None):
    k_x, k_w, k_g, k_b, k_m, k_v = jax.random.split(key, 6)
    x = jax.random.normal(k_x, (N, Cin, H, W), jnp.float32)
    weight = jax.random.normal(k_w, (Cout, Cin // groups, K, K),
                               jnp.float32) * 0.1
    gamma = jax.random.uniform(k_g, (Cout,), jnp.float32, 0.5, 1.5)
    beta = jax.random.normal(k_b, (Cout,), jnp.float32) * 0.1
    mean = jax.random.normal(k_m, (Cout,), jnp.float32) * 0.1
    var = jax.random.uniform(k_v, (Cout,), jnp.float32, 0.5, 1.5)

    out = conv_bn(x, weight, gamma, beta, mean, var, stride=stride,
                  padding=padding, dilation=dilation, groups=groups,
                  tile_oh=tile_oh)
    out = jax.block_until_ready(out)
    ref = _reference(x, weight, gamma, beta, mean, var, stride=stride,
                     padding=padding, dilation=dilation, groups=groups)
    assert out.shape == ref.shape, (out.shape, ref.shape)
    # bf16 output (+ bf16 per-tap products on the depthwise path) => loose-ish
    # tolerance; a real indexing bug produces O(1) errors and still fails.
    np.testing.assert_allclose(np.asarray(out.astype(jnp.float32)),
                               np.asarray(ref), rtol=2e-2, atol=5e-2)


if __name__ == "__main__":
    keys = jax.random.split(jax.random.PRNGKey(0), 8)
    # 1) dense 3x3, groups=1 (conv1-like, unaligned Cin -> per-tap MXU
    #    accumulation), two row tiles per image.
    _run_case(keys[0], N=2, Cin=4, Cout=8, H=16, W=16, K=3, padding=1,
              tile_oh=8)
    # 2) depthwise 3x3 stride 1 with a partial (masked) last row tile.
    _run_case(keys[1], N=2, Cin=8, Cout=8, H=20, W=16, K=3, padding=1,
              groups=8, tile_oh=8)
    # 3) pointwise 1x1 (the bulk of ShuffleNetV2 FLOPs): single MXU matmul.
    _run_case(keys[2], N=2, Cin=8, Cout=16, H=16, W=16, K=1)
    # 4) grouped 1 < groups < Cin fallback path.
    _run_case(keys[3], N=2, Cin=8, Cout=8, H=16, W=16, K=3, padding=1,
              groups=2, tile_oh=8)
    # 5) depthwise 3x3 stride 2 (ShuffleNetV2 downsample branch): exercises
    #    the space-to-depth phase indexing.
    _run_case(keys[4], N=2, Cin=8, Cout=8, H=16, W=16, K=3, stride=2,
              padding=1, groups=8)
    # 6) dense 3x3 stride 2.
    _run_case(keys[5], N=1, Cin=4, Cout=8, H=16, W=16, K=3, stride=2,
              padding=1)
    # 7) dense 3x3 dilation 2.
    _run_case(keys[6], N=1, Cin=4, Cout=8, H=16, W=16, K=3, padding=2,
              dilation=2)
    # 8) lane-aligned Cin (128) -> single im2col MXU matmul path.
    _run_case(keys[7], N=1, Cin=128, Cout=64, H=8, W=8, K=3, padding=1)
    print("KERNEL_OK")
</pallas_src>

<mosaic_0001>
module attributes {stable_mosaic.version = 11 : i64} {
  func.func @_conv_bn_mm_kernel(%arg0: i32, %arg1: i32, %arg2: memref<1x1x18x18x4xbf16, #tpu.memory_space<vmem>>, %arg3: memref<1x9x4x8xbf16, #tpu.memory_space<vmem>>, %arg4: memref<1x8xf32, #tpu.memory_space<vmem>>, %arg5: memref<1x8xf32, #tpu.memory_space<vmem>>, %arg6: memref<1x8x16x8xbf16, #tpu.memory_space<vmem>>) attributes {dimension_semantics = [#tpu.dimension_semantics<parallel>, #tpu.dimension_semantics<parallel>], iteration_bounds = array<i64: 2, 2>, scalar_prefetch = 0 : i64, scratch_operands = 0 : i64, tpu.core_type = #tpu.core_type<tc>, window_params = [{transform_indices = @transform_0, window_bounds = array<i64: 1, 1, 18, 18, 4>}, {pipeline_mode = #tpu.pipeline_mode<synchronous>, transform_indices = @transform_1, window_bounds = array<i64: 1, 9, 4, 8>}, {pipeline_mode = #tpu.pipeline_mode<synchronous>, transform_indices = @transform_2, window_bounds = array<i64: 1, 8>}, {pipeline_mode = #tpu.pipeline_mode<synchronous>, transform_indices = @transform_3, window_bounds = array<i64: 1, 8>}, {transform_indices = @transform_4, window_bounds = array<i64: 1, 8, 16, 8>}]} {
    %c8_i32 = arith.constant 8 : i32
    %0 = arith.muli %arg1, %c8_i32 : i32
    %1 = tpu.assume_multiple %0, 8 : i32
    %c0_i32 = arith.constant 0 : i32
    %2 = arith.addi %1, %c0_i32 : i32
    %c0 = arith.constant 0 : index
    %c0_0 = arith.constant 0 : index
    %3 = arith.index_cast %2 : i32 to index
    %c0_1 = arith.constant 0 : index
    %c0_2 = arith.constant 0 : index
    %4 = vector.load %arg2[%c0, %c0_0, %3, %c0_1, %c0_2] : memref<1x1x18x18x4xbf16, #tpu.memory_space<vmem>>, vector<1x1x8x16x4xbf16>
    %5 = vector.shape_cast %4 : vector<1x1x8x16x4xbf16> to vector<8x16x4xbf16>
    %c0_i32_3 = arith.constant 0 : i32
    %6 = arith.addi %1, %c0_i32_3 : i32
    %c0_4 = arith.constant 0 : index
    %c0_5 = arith.constant 0 : index
    %7 = arith.index_cast %6 : i32 to index
    %c1 = arith.constant 1 : index
    %c0_6 = arith.constant 0 : index
    %8 = vector.load %arg2[%c0_4, %c0_5, %7, %c1, %c0_6] : memref<1x1x18x18x4xbf16, #tpu.memory_space<vmem>>, vector<1x1x8x16x4xbf16>
    %9 = vector.shape_cast %8 : vector<1x1x8x16x4xbf16> to vector<8x16x4xbf16>
    %c0_i32_7 = arith.constant 0 : i32
    %10 = arith.addi %1, %c0_i32_7 : i32
    %c0_8 = arith.constant 0 : index
    %c0_9 = arith.constant 0 : index
    %11 = arith.index_cast %10 : i32 to index
    %c2 = arith.constant 2 : index
    %c0_10 = arith.constant 0 : index
    %12 = vector.load %arg2[%c0_8, %c0_9, %11, %c2, %c0_10] : memref<1x1x18x18x4xbf16, #tpu.memory_space<vmem>>, vector<1x1x8x16x4xbf16>
    %13 = vector.shape_cast %12 : vector<1x1x8x16x4xbf16> to vector<8x16x4xbf16>
    %c1_i32 = arith.constant 1 : i32
    %14 = arith.addi %1, %c1_i32 : i32
    %c0_11 = arith.constant 0 : index
    %c0_12 = arith.constant 0 : index
    %15 = arith.index_cast %14 : i32 to index
    %c0_13 = arith.constant 0 : index
    %c0_14 = arith.constant 0 : index
    %16 = vector.load %arg2[%c0_11, %c0_12, %15, %c0_13, %c0_14] : memref<1x1x18x18x4xbf16, #tpu.memory_space<vmem>>, vector<1x1x8x16x4xbf16>
    %17 = vector.shape_cast %16 : vector<1x1x8x16x4xbf16> to vector<8x16x4xbf16>
    %c1_i32_15 = arith.constant 1 : i32
    %18 = arith.addi %1, %c1_i32_15 : i32
    %c0_16 = arith.constant 0 : index
    %c0_17 = arith.constant 0 : index
    %19 = arith.index_cast %18 : i32 to index
    %c1_18 = arith.constant 1 : index
    %c0_19 = arith.constant 0 : index
    %20 = vector.load %arg2[%c0_16, %c0_17, %19, %c1_18, %c0_19] : memref<1x1x18x18x4xbf16, #tpu.memory_space<vmem>>, vector<1x1x8x16x4xbf16>
    %21 = vector.shape_cast %20 : vector<1x1x8x16x4xbf16> to vector<8x16x4xbf16>
    %c1_i32_20 = arith.constant 1 : i32
    %22 = arith.addi %1, %c1_i32_20 : i32
    %c0_21 = arith.constant 0 : index
    %c0_22 = arith.constant 0 : index
    %23 = arith.index_cast %22 : i32 to index
    %c2_23 = arith.constant 2 : index
    %c0_24 = arith.constant 0 : index
    %24 = vector.load %arg2[%c0_21, %c0_22, %23, %c2_23, %c0_24] : memref<1x1x18x18x4xbf16, #tpu.memory_space<vmem>>, vector<1x1x8x16x4xbf16>
    %25 = vector.shape_cast %24 : vector<1x1x8x16x4xbf16> to vector<8x16x4xbf16>
    %c2_i32 = arith.constant 2 : i32
    %26 = arith.addi %1, %c2_i32 : i32
    %c0_25 = arith.constant 0 : index
    %c0_26 = arith.constant 0 : index
    %27 = arith.index_cast %26 : i32 to index
    %c0_27 = arith.constant 0 : index
    %c0_28 = arith.constant 0 : index
    %28 = vector.load %arg2[%c0_25, %c0_26, %27, %c0_27, %c0_28] : memref<1x1x18x18x4xbf16, #tpu.memory_space<vmem>>, vector<1x1x8x16x4xbf16>
    %29 = vector.shape_cast %28 : vector<1x1x8x16x4xbf16> to vector<8x16x4xbf16>
    %c2_i32_29 = arith.constant 2 : i32
    %30 = arith.addi %1, %c2_i32_29 : i32
    %c0_30 = arith.constant 0 : index
    %c0_31 = arith.constant 0 : index
    %31 = arith.index_cast %30 : i32 to index
    %c1_32 = arith.constant 1 : index
    %c0_33 = arith.constant 0 : index
    %32 = vector.load %arg2[%c0_30, %c0_31, %31, %c1_32, %c0_33] : memref<1x1x18x18x4xbf16, #tpu.memory_space<vmem>>, vector<1x1x8x16x4xbf16>
    %33 = vector.shape_cast %32 : vector<1x1x8x16x4xbf16> to vector<8x16x4xbf16>
    %c2_i32_34 = arith.constant 2 : i32
    %34 = arith.addi %1, %c2_i32_34 : i32
    %c0_35 = arith.constant 0 : index
    %c0_36 = arith.constant 0 : index
    %35 = arith.index_cast %34 : i32 to index
    %c2_37 = arith.constant 2 : index
    %c0_38 = arith.constant 0 : index
    %36 = vector.load %arg2[%c0_35, %c0_36, %35, %c2_37, %c0_38] : memref<1x1x18x18x4xbf16, #tpu.memory_space<vmem>>, vector<1x1x8x16x4xbf16>
    %37 = vector.shape_cast %36 : vector<1x1x8x16x4xbf16> to vector<8x16x4xbf16>
    %cst = arith.constant 0.000000e+00 : f32
    %38 = vector.broadcast %cst : f32 to vector<128x8xf32>
    %39 = vector.shape_cast %5 : vector<8x16x4xbf16> to vector<128x4xbf16>
    %c0_39 = arith.constant 0 : index
    %c0_40 = arith.constant 0 : index
    %c0_41 = arith.constant 0 : index
    %c0_42 = arith.constant 0 : index
    %40 = vector.load %arg3[%c0_39, %c0_40, %c0_41, %c0_42] : memref<1x9x4x8xbf16, #tpu.memory_space<vmem>>, vector<1x1x4x8xbf16>
    %41 = vector.shape_cast %40 : vector<1x1x4x8xbf16> to vector<4x8xbf16>
    %cst_43 = arith.constant dense<0.000000e+00> : vector<128x8xf32>
    %42 = tpu.matmul %39, %41, %cst_43 {dimension_numbers = #tpu.dot_dimension_numbers<[1], [0], [0], [1], [0, 0, 1, 1], [], []>} : vector<128x4xbf16>, vector<4x8xbf16>, vector<128x8xf32> -> vector<128x8xf32>
    %43 = arith.addf %38, %42 : vector<128x8xf32>
    %44 = vector.shape_cast %9 : vector<8x16x4xbf16> to vector<128x4xbf16>
    %c0_44 = arith.constant 0 : index
    %c1_45 = arith.constant 1 : index
    %c0_46 = arith.constant 0 : index
    %c0_47 = arith.constant 0 : index
    %45 = vector.load %arg3[%c0_44, %c1_45, %c0_46, %c0_47] : memref<1x9x4x8xbf16, #tpu.memory_space<vmem>>, vector<1x1x4x8xbf16>
    %46 = vector.shape_cast %45 : vector<1x1x4x8xbf16> to vector<4x8xbf16>
    %cst_48 = arith.constant dense<0.000000e+00> : vector<128x8xf32>
    %47 = tpu.matmul %44, %46, %cst_48 {dimension_numbers = #tpu.dot_dimension_numbers<[1], [0], [0], [1], [0, 0, 1, 1], [], []>} : vector<128x4xbf16>, vector<4x8xbf16>, vector<128x8xf32> -> vector<128x8xf32>
    %48 = arith.addf %43, %47 : vector<128x8xf32>
    %49 = vector.shape_cast %13 : vector<8x16x4xbf16> to vector<128x4xbf16>
    %c0_49 = arith.constant 0 : index
    %c2_50 = arith.constant 2 : index
    %c0_51 = arith.constant 0 : index
    %c0_52 = arith.constant 0 : index
    %50 = vector.load %arg3[%c0_49, %c2_50, %c0_51, %c0_52] : memref<1x9x4x8xbf16, #tpu.memory_space<vmem>>, vector<1x1x4x8xbf16>
    %51 = vector.shape_cast %50 : vector<1x1x4x8xbf16> to vector<4x8xbf16>
    %cst_53 = arith.constant dense<0.000000e+00> : vector<128x8xf32>
    %52 = tpu.matmul %49, %51, %cst_53 {dimension_numbers = #tpu.dot_dimension_numbers<[1], [0], [0], [1], [0, 0, 1, 1], [], []>} : vector<128x4xbf16>, vector<4x8xbf16>, vector<128x8xf32> -> vector<128x8xf32>
    %53 = arith.addf %48, %52 : vector<128x8xf32>
    %54 = vector.shape_cast %17 : vector<8x16x4xbf16> to vector<128x4xbf16>
    %c0_54 = arith.constant 0 : index
    %c3 = arith.constant 3 : index
    %c0_55 = arith.constant 0 : index
    %c0_56 = arith.constant 0 : index
    %55 = vector.load %arg3[%c0_54, %c3, %c0_55, %c0_56] : memref<1x9x4x8xbf16, #tpu.memory_space<vmem>>, vector<1x1x4x8xbf16>
    %56 = vector.shape_cast %55 : vector<1x1x4x8xbf16> to vector<4x8xbf16>
    %cst_57 = arith.constant dense<0.000000e+00> : vector<128x8xf32>
    %57 = tpu.matmul %54, %56, %cst_57 {dimension_numbers = #tpu.dot_dimension_numbers<[1], [0], [0], [1], [0, 0, 1, 1], [], []>} : vector<128x4xbf16>, vector<4x8xbf16>, vector<128x8xf32> -> vector<128x8xf32>
    %58 = arith.addf %53, %57 : vector<128x8xf32>
    %59 = vector.shape_cast %21 : vector<8x16x4xbf16> to vector<128x4xbf16>
    %c0_58 = arith.constant 0 : index
    %c4 = arith.constant 4 : index
    %c0_59 = arith.constant 0 : index
    %c0_60 = arith.constant 0 : index
    %60 = vector.load %arg3[%c0_58, %c4, %c0_59, %c0_60] : memref<1x9x4x8xbf16, #tpu.memory_space<vmem>>, vector<1x1x4x8xbf16>
    %61 = vector.shape_cast %60 : vector<1x1x4x8xbf16> to vector<4x8xbf16>
    %cst_61 = arith.constant dense<0.000000e+00> : vector<128x8xf32>
    %62 = tpu.matmul %59, %61, %cst_61 {dimension_numbers = #tpu.dot_dimension_numbers<[1], [0], [0], [1], [0, 0, 1, 1], [], []>} : vector<128x4xbf16>, vector<4x8xbf16>, vector<128x8xf32> -> vector<128x8xf32>
    %63 = arith.addf %58, %62 : vector<128x8xf32>
    %64 = vector.shape_cast %25 : vector<8x16x4xbf16> to vector<128x4xbf16>
    %c0_62 = arith.constant 0 : index
    %c5 = arith.constant 5 : index
    %c0_63 = arith.constant 0 : index
    %c0_64 = arith.constant 0 : index
    %65 = vector.load %arg3[%c0_62, %c5, %c0_63, %c0_64] : memref<1x9x4x8xbf16, #tpu.memory_space<vmem>>, vector<1x1x4x8xbf16>
    %66 = vector.shape_cast %65 : vector<1x1x4x8xbf16> to vector<4x8xbf16>
    %cst_65 = arith.constant dense<0.000000e+00> : vector<128x8xf32>
    %67 = tpu.matmul %64, %66, %cst_65 {dimension_numbers = #tpu.dot_dimension_numbers<[1], [0], [0], [1], [0, 0, 1, 1], [], []>} : vector<128x4xbf16>, vector<4x8xbf16>, vector<128x8xf32> -> vector<128x8xf32>
    %68 = arith.addf %63, %67 : vector<128x8xf32>
    %69 = vector.shape_cast %29 : vector<8x16x4xbf16> to vector<128x4xbf16>
    %c0_66 = arith.constant 0 : index
    %c6 = arith.constant 6 : index
    %c0_67 = arith.constant 0 : index
    %c0_68 = arith.constant 0 : index
    %70 = vector.load %arg3[%c0_66, %c6, %c0_67, %c0_68] : memref<1x9x4x8xbf16, #tpu.memory_space<vmem>>, vector<1x1x4x8xbf16>
    %71 = vector.shape_cast %70 : vector<1x1x4x8xbf16> to vector<4x8xbf16>
    %cst_69 = arith.constant dense<0.000000e+00> : vector<128x8xf32>
    %72 = tpu.matmul %69, %71, %cst_69 {dimension_numbers = #tpu.dot_dimension_numbers<[1], [0], [0], [1], [0, 0, 1, 1], [], []>} : vector<128x4xbf16>, vector<4x8xbf16>, vector<128x8xf32> -> vector<128x8xf32>
    %73 = arith.addf %68, %72 : vector<128x8xf32>
    %74 = vector.shape_cast %33 : vector<8x16x4xbf16> to vector<128x4xbf16>
    %c0_70 = arith.constant 0 : index
    %c7 = arith.constant 7 : index
    %c0_71 = arith.constant 0 : index
    %c0_72 = arith.constant 0 : index
    %75 = vector.load %arg3[%c0_70, %c7, %c0_71, %c0_72] : memref<1x9x4x8xbf16, #tpu.memory_space<vmem>>, vector<1x1x4x8xbf16>
    %76 = vector.shape_cast %75 : vector<1x1x4x8xbf16> to vector<4x8xbf16>
    %cst_73 = arith.constant dense<0.000000e+00> : vector<128x8xf32>
    %77 = tpu.matmul %74, %76, %cst_73 {dimension_numbers = #tpu.dot_dimension_numbers<[1], [0], [0], [1], [0, 0, 1, 1], [], []>} : vector<128x4xbf16>, vector<4x8xbf16>, vector<128x8xf32> -> vector<128x8xf32>
    %78 = arith.addf %73, %77 : vector<128x8xf32>
    %79 = vector.shape_cast %37 : vector<8x16x4xbf16> to vector<128x4xbf16>
    %c0_74 = arith.constant 0 : index
    %c8 = arith.constant 8 : index
    %c0_75 = arith.constant 0 : index
    %c0_76 = arith.constant 0 : index
    %80 = vector.load %arg3[%c0_74, %c8, %c0_75, %c0_76] : memref<1x9x4x8xbf16, #tpu.memory_space<vmem>>, vector<1x1x4x8xbf16>
    %81 = vector.shape_cast %80 : vector<1x1x4x8xbf16> to vector<4x8xbf16>
    %cst_77 = arith.constant dense<0.000000e+00> : vector<128x8xf32>
    %82 = tpu.matmul %79, %81, %cst_77 {dimension_numbers = #tpu.dot_dimension_numbers<[1], [0], [0], [1], [0, 0, 1, 1], [], []>} : vector<128x4xbf16>, vector<4x8xbf16>, vector<128x8xf32> -> vector<128x8xf32>
    %83 = arith.addf %78, %82 : vector<128x8xf32>
    %c0_78 = arith.constant 0 : index
    %c0_79 = arith.constant 0 : index
    %84 = vector.load %arg4[%c0_78, %c0_79] : memref<1x8xf32, #tpu.memory_space<vmem>>, vector<1x8xf32>
    %85 = vector.broadcast %84 : vector<1x8xf32> to vector<128x8xf32>
    %86 = arith.mulf %83, %85 : vector<128x8xf32>
    %c0_80 = arith.constant 0 : index
    %c0_81 = arith.constant 0 : index
    %87 = vector.load %arg5[%c0_80, %c0_81] : memref<1x8xf32, #tpu.memory_space<vmem>>, vector<1x8xf32>
    %88 = vector.broadcast %87 : vector<1x8xf32> to vector<128x8xf32>
    %89 = arith.addf %86, %88 : vector<128x8xf32>
    %90 = vector.shape_cast %89 : vector<128x8xf32> to vector<8x16x8xf32>
    %91 = arith.truncf %90 : vector<8x16x8xf32> to vector<8x16x8xbf16>
    %c0_82 = arith.constant 0 : index
    %c0_83 = arith.constant 0 : index
    %c0_84 = arith.constant 0 : index
    %c0_85 = arith.constant 0 : index
    %92 = vector.load %arg6[%c0_82, %c0_83, %c0_84, %c0_85] : memref<1x8x16x8xbf16, #tpu.memory_space<vmem>>, vector<1x8x16x8xbf16>
    %93 = vector.shape_cast %92 : vector<1x8x16x8xbf16> to vector<8x16x8xbf16>
    %94 = vector.shape_cast %91 : vector<8x16x8xbf16> to vector<1x8x16x8xbf16>
    tpu.vector_store %arg6[%c0_82, %c0_83, %c0_84, %c0_85], %94 {strides = array<i32>} : memref<1x8x16x8xbf16, #tpu.memory_space<vmem>>, vector<1x8x16x8xbf16>,
    return
  }
  func.func @transform_0(%arg0: i32, %arg1: i32) -> (i32, i32, i32, i32, i32) {
    %c0_i32 = arith.constant 0 : i32
    %c0_i32_0 = arith.constant 0 : i32
    %c0_i32_1 = arith.constant 0 : i32
    %c0_i32_2 = arith.constant 0 : i32
    %c0_i32_3 = arith.constant 0 : i32
    return %arg0, %c0_i32, %c0_i32_0, %c0_i32_1, %c0_i32_2 : i32, i32, i32, i32, i32
  }
  func.func @transform_1(%arg0: i32, %arg1: i32) -> (i32, i32, i32, i32) {
    %c0_i32 = arith.constant 0 : i32
    %c0_i32_0 = arith.constant 0 : i32
    %c0_i32_1 = arith.constant 0 : i32
    %c0_i32_2 = arith.constant 0 : i32
    %c0_i32_3 = arith.constant 0 : i32
    return %c0_i32, %c0_i32_0, %c0_i32_1, %c0_i32_2 : i32, i32, i32, i32
  }
  func.func @transform_2(%arg0: i32, %arg1: i32) -> (i32, i32) {
    %c0_i32 = arith.constant 0 : i32
    %c0_i32_0 = arith.constant 0 : i32
    %c0_i32_1 = arith.constant 0 : i32
    return %c0_i32, %c0_i32_0 : i32, i32
  }
  func.func @transform_3(%arg0: i32, %arg1: i32) -> (i32, i32) {
    %c0_i32 = arith.constant 0 : i32
    %c0_i32_0 = arith.constant 0 : i32
    %c0_i32_1 = arith.constant 0 : i32
    return %c0_i32, %c0_i32_0 : i32, i32
  }
  func.func @transform_4(%arg0: i32, %arg1: i32) -> (i32, i32, i32, i32) {
    %c0_i32 = arith.constant 0 : i32
    %c0_i32_0 = arith.constant 0 : i32
    %c0_i32_1 = arith.constant 0 : i32
    return %arg0, %arg1, %c0_i32, %c0_i32_0 : i32, i32, i32, i32
  }
}

</mosaic_0001>

<bundles_post_ra>
// kernel: tpu_custom_call.1
= control target key start
LH: loop header
LB: loop body
LE: loop exit
PB: predicated region body
PF: predicated region fallthrough
CT: control target
= control target key end

     0   :  { %s3684_s15 = smov 0   ;;  %s3686_s16 = smov 0   ;;  %s4734_s0 = inlined_call_operand.vmem [shape: bf16[2,1,18,18,4], index: 0, kind: input, shape index: {}]   ;;  %s4735_s1 = inlined_call_operand.vmem [shape: bf16[1,9,4,8], index: 1, kind: input, shape index: {}]   ;;  %s4736_s2 = inlined_call_operand.vmem [shape: f32[1,8], index: 2, kind: input, shape index: {}]   ;;  %s4737_s3 = inlined_call_operand.vmem [shape: f32[1,8], index: 3, kind: input, shape index: {}]   ;;  %s4738_s4 = inlined_call_operand.vmem [shape: bf16[2,16,16,8], index: 4, kind: output, shape index: {}]  }
   0x1   :  { %s3688_s17 = smov 0   ;;  %s3690_s18 = smov 0  }
   0x2   :  { %s3692_s19 = smov 0  }
   0x3 LB: > { %s23_s20 = sadd.s32 1, %s3649_s17  ;;  %s26_s21 = sadd.s32 1, %s3653_s18  ;;  %s3657_s19 = sphi %s3692_s19, %s14_s19   ;;  %s3653_s18 = sphi %s3690_s18, %s4772_s18   ;;  %s3649_s17 = sphi %s3688_s17, %s4771_s17   ;;  %s3645_s16 = sphi %s3686_s16, %s4770_s16   ;;  %s3641_s15 = sphi %s3684_s15, %s4769_s15  }
   0x4   : > { %p24_p0 = scmp.ge.s32.totalorder %s23_s20, 2  ;;  %p2872_p1 = scmp.ge.s32.totalorder %s3657_s19, 1 }
   0x5   : > { %p176_p2 = scmp.lt.s32.totalorder %s3657_s19, 5 }
   0x6   : > { %s4774_s20 = smov (%p24_p0, %s23_s20), 0  ;;  %s4776_s21 = smov (!%p24_p0, %s26_s21), %s3653_s18 }
   0x7   : > { %p177_p3 = pnand %p2872_p1, %p176_p2  ;;  %p28_p4 = scmp.ge.s32.totalorder %s4776_s21, 2 }
   0x9   : > { %s4778_s21 = smov (%p28_p4, %s4776_s21), 0  ;;  %180 = sbr.rel (%p177_p3) target bundleno = 423 (0x1a7), region = 36 }
  0x10   : > { %v2949_v0 = vld [vmem:[%s4735_s1 + $0x2] sm:$0x3]  ;;  %vm579_vm0 = vcmask 1041408   ;;  %v3024_v1 = vld [vmem:[%s4735_s1 + $0x8] sm:$0x3]  ;;  %p207_p5 = scmp.lt.s32.totalorder %s3645_s16, 1 }
  0x11   : > { %3535 = vmatprep.subr.msk.bf16.mxu1 %vm579_vm0, %v2949_v0  ;;  %3539 = vmatprep.subr.msk.bf16.mxu0 %vm579_vm0, %v3024_v1  ;;  %v581_v2 = vsel %vm579_vm0, %v2949_v0, 0  ;;  %v3726_v3 = vsel %vm579_vm0, %v3024_v1, 0  ;;  %v332_v4 = vld [vmem:[%s4735_s1] sm:$0x3]  ;;  %s3145_s28 = smul.u32 96, %s3641_s15  ;;  %vm554_vm3 = vcmask 31744  }
  0x12   : > { %3244 = vmatpush3.bf16.msra.mxu1 %v581_v2  ;;  %3316 = vmatpush3.bf16.msra.mxu0 %v3726_v3  ;;  %s4780_s16 = smov (!%p207_p5, %s3645_s16), 1  ;;  %v3049_v5 = vld [vmem:[%s4735_s1 + $0xa] sm:$0x3]  ;;  %vm333_vm1 = vsmask.f32 3328  ;;  %v3768_v17 = vsel %vm579_vm0, %v332_v4, 0 }
  0x13   : > { %3536 = vmatprep.subr.msk.bf16.mxu1 %vm579_vm0, %v332_v4  ;;  %s3545_s5 = smul.u32 216, %s4780_s16  ;;  %3541 = vmatprep.subr.msk.bf16.mxu0 %vm579_vm0, %v3049_v5  ;;  %vm334_vm2 = vsmask.f32 7440  ;;  %v3786_v36 = vsel %vm579_vm0, %v3049_v5, 0  ;;  %v3802_v50 = vld [vmem:[%s4735_s1 + $0xc] sm:$0x3] }
  0x14   : > { %vm3781_vm4 = vmor %vm333_vm1, %vm334_vm2  ;;  %v3818_v1 = vsel %vm579_vm0, %v3802_v50, 0  ;;  %vm860_vm5 = vcmask 1042432   ;;  %vm861_vm6 = vcmask 1046532   ;;  %s2874_s29 = sshll.u32 %s3641_s15, 3  ;;  %vm2751_vm8 = vcmask 60416  }
  0x15   : > { %s211_s8 = scalar_lea.vmem %s4734_s0, %s3545_s5  ;;  %vm3936_vm7 = vmor %vm860_vm5, %vm861_vm6  ;;  %p215_p6 = scmp.lt.s32.totalorder %s2874_s29, 15 }
  0x16   : > { %s3744_s9 = scalar_lea.vmem %s211_s8, %s3145_s28  ;;  %s2876_s5 = sshll.u32 %s4780_s16, 5 }
  0x17   : > { %v3747_v6 = vld [vmem:[%s3744_s9] sm:$0xf]  ;;  %v3750_v7 = vld [vmem:[%s3744_s9 + $0x4] sm:$0xf]  ;;  %v3753_v8 = vld [vmem:[%s3744_s9 + $0x8] sm:$0x1] }
  0x18   : > { %v337_v9 = vshrl.u32 %v3747_v6, 16  ;;  %v340_v10 = vshll.u32 %v3747_v6, 16  ;;  %v346_v11 = vshll.u32 %v3750_v7, 16  ;;  %v350_v12 = vshrl.u32 %v3750_v7, 16  ;;  %v2883_v13 = vld [vmem:[%s3744_s9 + $0xc] sm:$0xf] }
  0x19   : > { %v356_v14 = vshll.u32 %v3753_v8, 16  ;;  %v3762_v15 = vld [vmem:[%s3744_s9 + $0x10] sm:$0xf]  ;;  %v3765_v16 = vld [vmem:[%s3744_s9 + $0x14] sm:$0x1]  ;;  %v1268_v23 = vshrl.u32 %v2883_v13, 16 }
  0x1a   : > { %v339_v18 = vrot.slane %v337_v9, 4  ;;  %v342_v19 = vrot.slane %v340_v10, 5  ;;  %v348_v20 = vrot.slane %v346_v11, 5  ;;  %v352_v21 = vrot.slane %v350_v12, 4  ;;  %v3774_v30 = vld [vmem:[%s3744_s9 + $0xc] sm:$0xf] }
  0x1b   : > { %v358_v22 = vrot.slane %v356_v14, 5  ;;  %v1271_v24 = vshll.u32 %v2883_v13, 16  ;;  %v1277_v25 = vshll.u32 %v3762_v15, 16  ;;  %v1281_v28 = vshrl.u32 %v3762_v15, 16  ;;  %v3777_v31 = vld [vmem:[%s3744_s9 + $0x10] sm:$0xf] }
  0x1c   : > { %v343_v26 = vor.u32 %v342_v19, %v339_v18  ;;  %v353_v27 = vor.u32 %v352_v21, %v348_v20  ;;  %v1287_v29 = vshll.u32 %v3765_v16, 16  ;;  %v1270_v33 = vrot.slane %v1268_v23, 4  ;;  %v3789_v42 = vld [vmem:[%s3744_s9 + $0x14] sm:$0x1]  ;;  %v2885_v55 = vld [vmem:[%s3744_s9 + $0x18] sm:$0xf] }
  0x1d   : > { %v1273_v34 = vrot.slane %v1271_v24, 5  ;;  %v1279_v35 = vrot.slane %v1277_v25, 5  ;;  %v1283_v39 = vrot.slane %v1281_v28, 4  ;;  %v361_v43 = vshrl.u32 %v3774_v30, 16  ;;  %v3807_v60 = vld [vmem:[%s3744_s9 + $0x1c] sm:$0xf] }
  0x1e   : > { %v344_v37 = vrot.slane %v343_v26, 4  ;;  %v354_v38 = vrot.slane %v353_v27, 4  ;;  %v1289_v40 = vrot.slane %v1287_v29, 5  ;;  %v364_v44 = vshll.u32 %v3774_v30, 16  ;;  %v3814_v0 = vld [vmem:[%s3744_s9 + $0x20] sm:$0x1] }
  0x1f   : > { %v1274_v41 = vor.u32 %v1273_v34, %v1270_v33  ;;  %v370_v45 = vshll.u32 %v3777_v31, 16  ;;  %v1284_v48 = vor.u32 %v1283_v39, %v1279_v35  ;;  %v374_v49 = vshrl.u32 %v3777_v31, 16  ;;  %v3824_v14 = vld [vmem:[%s3744_s9 + $0x18] sm:$0xf]  ;;  %v3836_v27 = vld [vmem:[%s3744_s9 + $0x20] sm:$0x1] }
  0x20   : > { %v349_v46 = vsel %vm3781_vm4, %v344_v37, %v348_v20  ;;  %v359_v47 = vsel %vm3781_vm4, %v354_v38, %v358_v22  ;;  %v363_v53 = vrot.slane %v361_v43, 4  ;;  %v366_v54 = vrot.slane %v364_v44, 5  ;;  %v3829_v22 = vld [vmem:[%s3744_s9 + $0x1c] sm:$0xf]  ;;  %s4782_s29 = smov (!%p215_p6, %s2874_s29), 15 }
  0x21   : > { %v2950_v51 = vcombine.low %v349_v46, %v359_v47  ;;  %v1275_v52 = vrot.slane %v1274_v41, 4  ;;  %v1285_v56 = vrot.slane %v1284_v48, 4  ;;  %v372_v57 = vrot.slane %v370_v45, 5  ;;  %v3850_v46 = vld [vmem:[%s4735_s1 + $0x4] sm:$0x3]  ;;  %s2875_s30 = sshll.u32 %s4782_s29, 1 }
  0x22   : > { %v376_v58 = vrot.slane %v374_v49, 4  ;;  %v380_v59 = vshll.u32 %v3789_v42, 16  ;;  %v1646_v62 = vrot.slane %v3765_v16, 5  ;;  %v367_v63 = vor.u32 %v366_v54, %v363_v53  ;;  %v3968_v16 = vld [vmem:[%s3744_s9 + $0x4c] sm:$0xf]  ;;  %s219_s6 = sadd.s32 %s2876_s5, %s2875_s30 }
  0x23   : > { %3245 = vmatprep.mubr.msk.bf16.mxu1 %vm554_vm3, %v2950_v51  ;;  %v1280_v61 = vsel %vm3781_vm4, %v1275_v52, %v1279_v35  ;;  %v1290_v2 = vsel %vm3781_vm4, %v1285_v56, %v1289_v40  ;;  %v1292_v9 = vshrl.u32 %v2885_v55, 16  ;;  %v1295_v12 = vshll.u32 %v2885_v55, 16  ;;  %v2887_v35 = vld [vmem:[%s3744_s9 + $0x24] sm:$0xf]  ;;  %v3854_v51 = vld [vmem:[%s3744_s9 + $0x28] sm:$0xf] }
  0x24   : > { %v377_v4 = vor.u32 %v376_v58, %v372_v57  ;;  %v382_v5 = vrot.slane %v380_v59, 5  ;;  %v3025_v10 = vcombine.low %v1280_v61, %v1290_v2  ;;  %v368_v11 = vrot.slane %v367_v63, 4  ;;  %v3863_v2 = vld [vmem:[%s3744_s9 + $0x24] sm:$0xf]  ;;  %s2877_s10 = sshll.u32 %s219_s6, 2 }
  0x25   : > { %v1301_v13 = vshll.u32 %v3807_v60, 16  ;;  %v1294_v19 = vrot.slane %v1292_v9, 4  ;;  %v1305_v20 = vshrl.u32 %v3807_v60, 16  ;;  %v1311_v21 = vshll.u32 %v3814_v0, 16  ;;  %s4657_s12 = scalar_lea.vmem %s4738_s4, %s2877_s10 }
  0x26   : > { %v378_v18 = vrot.slane %v377_v4, 4  ;;  %3317 = vmatprep.mubr.msk.bf16.mxu0 %vm554_vm3, %v3025_v10  ;;  %v373_v23 = vsel %vm3781_vm4, %v368_v11, %v372_v57  ;;  %v1297_v24 = vrot.slane %v1295_v12, 5  ;;  %v1650_v26 = vrot.slane %v3807_v60, 5  ;;  %v3858_v57 = vld [vmem:[%s3744_s9 + $0x2c] sm:$0x1] }
  0x27   : > { %v1303_v25 = vrot.slane %v1301_v13, 5  ;;  %v1307_v29 = vrot.slane %v1305_v20, 4  ;;  %v1313_v33 = vrot.slane %v1311_v21, 5  ;;  %v1653_v34 = vrot.slane %v3814_v0, 5 }
  0x28   : > { %v383_v28 = vsel %vm3781_vm4, %v378_v18, %v382_v5  ;;  %v1298_v38 = vor.u32 %v1297_v24, %v1294_v19  ;;  %v385_v39 = vshrl.u32 %v3824_v14, 16  ;;  %v388_v40 = vshll.u32 %v3824_v14, 16  ;;  %v3873_v18 = vld [vmem:[%s3744_s9 + $0x28] sm:$0xf] }
  0x29   : > { %v2951_v37 = vcombine.low %v373_v23, %v383_v28  ;;  %v1308_v41 = vor.u32 %v1307_v29, %v1303_v25  ;;  %v394_v43 = vshll.u32 %v3829_v22, 16  ;;  %v398_v44 = vshrl.u32 %v3829_v22, 16  ;;  %v3880_v29 = vld [vmem:[%s3744_s9 + $0x2c] sm:$0x1] }
  0x2a   : > { %v404_v45 = vshll.u32 %v3836_v27, 16  ;;  %v1299_v47 = vrot.slane %v1298_v38, 4  ;;  %v387_v48 = vrot.slane %v385_v39, 4  ;;  %v390_v49 = vrot.slane %v388_v40, 5 }
  0x2b   : > { %3246 = vmatmul.mubr.msk.bf16.vlgmr.msra.gmra.mrb[0].mxu1 %vm554_vm3, %v2951_v37  ;;  %v1316_v52 = vshrl.u32 %v2887_v35, 16  ;;  %v1309_v53 = vrot.slane %v1308_v41, 4  ;;  %v396_v54 = vrot.slane %v394_v43, 5  ;;  %v400_v55 = vrot.slane %v398_v44, 4 }
  0x2c   : > { %3262 = vmatpush3.bf16.msra.mxu1 %v3768_v17  ;;  %v406_v56 = vrot.slane %v404_v45, 5  ;;  %v1304_v58 = vsel %vm3781_vm4, %v1299_v47, %v1303_v25  ;;  %v391_v59 = vor.u32 %v390_v49, %v387_v48  ;;  %v1319_v63 = vshll.u32 %v2887_v35, 16  ;;  %v2889_v35 = vld [vmem:[%s3744_s9 + $0x30] sm:$0xf]  ;;  %v3890_v47 = vld [vmem:[%s3744_s9 + $0x34] sm:$0xf] }
  0x2d   : > { %v1318_v61 = vrot.slane %v1316_v52, 4  ;;  %3537 = vmatprep.subr.msk.bf16.mxu1 %vm579_vm0, %v3850_v46  ;;  %v1314_v17 = vsel %vm3781_vm4, %v1309_v53, %v1313_v33  ;;  %v401_v4 = vor.u32 %v400_v55, %v396_v54  ;;  %v1325_v5 = vshll.u32 %v3854_v51, 16 }
  0x2e   : > { %v1329_v9 = vshrl.u32 %v3854_v51, 16  ;;  %v3026_v10 = vcombine.low %v1304_v58, %v1314_v17  ;;  %v392_v11 = vrot.slane %v391_v59, 4  ;;  %v1321_v12 = vrot.slane %v1319_v63, 5  ;;  %v3902_v59 = vld [vmem:[%s3744_s9 + $0x30] sm:$0xf] }
  0x2f   : > { %v1335_v13 = vshll.u32 %v3858_v57, 16  ;;  %v402_v19 = vrot.slane %v401_v4, 4  ;;  %v1327_v20 = vrot.slane %v1325_v5, 5  ;;  %v409_v23 = vshrl.u32 %v3863_v2, 16 }
  0x30   : > { %v1331_v21 = vrot.slane %v1329_v9, 4  ;;  %3318 = vmatmul.mubr.msk.bf16.vlgmr.msra.gmra.mrb[0].mxu0 %vm554_vm3, %v3026_v10  ;;  %v397_v24 = vsel %vm3781_vm4, %v392_v11, %v396_v54  ;;  %v1322_v25 = vor.u32 %v1321_v12, %v1318_v61  ;;  %v412_v33 = vshll.u32 %v3863_v2, 16  ;;  %v3908_v11 = vld [vmem:[%s3744_s9 + $0x34] sm:$0xf] }
  0x31   : > { %v1337_v28 = vrot.slane %v1335_v13, 5  ;;  %3334 = vmatpush3.bf16.msra.mxu0 %v3786_v36  ;;  %v407_v37 = vsel %vm3781_vm4, %v402_v19, %v406_v56  ;;  %v411_v39 = vrot.slane %v409_v23, 4  ;;  %v418_v40 = vshll.u32 %v3873_v18, 16  ;;  %v3899_v56 = vld [vmem:[%s3744_s9 + $0x38] sm:$0x1] }
  0x32   : > { %v1332_v38 = vor.u32 %v1331_v21, %v1327_v20  ;;  %v2952_v41 = vcombine.low %v397_v24, %v407_v37  ;;  %v1323_v43 = vrot.slane %v1322_v25, 4  ;;  %v414_v44 = vrot.slane %v412_v33, 5  ;;  %3542 = vmatprep.subr.msk.bf16.mxu0 %vm579_vm0, %v3802_v50  ;;  %v3917_v25 = vld [vmem:[%s3744_s9 + $0x38] sm:$0x1] }
  0x33   : > { %v422_v45 = vshrl.u32 %v3873_v18, 16  ;;  %v420_v48 = vrot.slane %v418_v40, 5  ;;  %v428_v49 = vshll.u32 %v3880_v29, 16  ;;  %v1340_v52 = vshrl.u32 %v2889_v35, 16 }
  0x34   : > { %v1333_v36 = vrot.slane %v1332_v38, 4  ;;  %3249 = vmatprep.mubr.msk.bf16.mxu1 %vm554_vm3, %v2952_v41  ;;  %v1328_v53 = vsel %vm3781_vm4, %v1323_v43, %v1327_v20  ;;  %v415_v54 = vor.u32 %v414_v44, %v411_v39  ;;  %v1343_v58 = vshll.u32 %v2889_v35, 16  ;;  %v2907_v39 = vld [vmem:[%s3744_s9 + $0xc] sm:$0xe] }
  0x35   : > { %v424_v55 = vrot.slane %v422_v45, 4  ;;  %v430_v61 = vrot.slane %v428_v49, 5  ;;  %v1342_v63 = vrot.slane %v1340_v52, 4  ;;  %v1349_v17 = vshll.u32 %v3890_v47, 16  ;;  %v3926_v45 = vld [vmem:[%s3744_s9 + $0x3c] sm:$0xf] }
  0x36   : > { %v1338_v50 = vsel %vm3781_vm4, %v1333_v36, %v1337_v28  ;;  %v416_v5 = vrot.slane %v415_v54, 4  ;;  %v1345_v10 = vrot.slane %v1343_v58, 5  ;;  %v1353_v13 = vshrl.u32 %v3890_v47, 16 }
  0x37   : > { %v3027_v4 = vcombine.low %v1328_v53, %v1338_v50  ;;  %v425_v9 = vor.u32 %v424_v55, %v420_v48  ;;  %v1351_v12 = vrot.slane %v1349_v17, 5  ;;  %v1359_v19 = vshll.u32 %v3899_v56, 16  ;;  %v3930_v53 = vld [vmem:[%s3744_s9 + $0x40] sm:$0xf] }
  0x38   : > { %v433_v20 = vshrl.u32 %v3902_v59, 16  ;;  %v421_v21 = vsel %vm3781_vm4, %v416_v5, %v420_v48  ;;  %v1346_v24 = vor.u32 %v1345_v10, %v1342_v63  ;;  %v436_v28 = vshll.u32 %v3902_v59, 16 }
  0x39   : > { %3321 = vmatprep.mubr.msk.bf16.mxu0 %vm554_vm3, %v3027_v4  ;;  %v426_v23 = vrot.slane %v425_v9, 4  ;;  %v1355_v33 = vrot.slane %v1353_v13, 4  ;;  %v1361_v35 = vrot.slane %v1359_v19, 5  ;;  %v442_v38 = vshll.u32 %v3908_v11, 16 }
  0x3a   : > { %v435_v37 = vrot.slane %v433_v20, 4  ;;  %v1347_v41 = vrot.slane %v1346_v24, 4  ;;  %v438_v43 = vrot.slane %v436_v28, 5  ;;  %v446_v44 = vshrl.u32 %v3908_v11, 16 }
  0x3b   : > { %v431_v40 = vsel %vm3781_vm4, %v426_v23, %v430_v61  ;;  %v1356_v48 = vor.u32 %v1355_v33, %v1351_v12  ;;  %v444_v49 = vrot.slane %v442_v38, 5  ;;  %v452_v52 = vshll.u32 %v3917_v25, 16 }
  0x3c   : > { %v2953_v36 = vcombine.low %v421_v21, %v431_v40  ;;  %v1352_v54 = vsel %vm3781_vm4, %v1347_v41, %v1351_v12  ;;  %v439_v55 = vor.u32 %v438_v43, %v435_v37  ;;  %v448_v58 = vrot.slane %v446_v44, 4  ;;  %v3944_v12 = vld [vmem:[%s3744_s9 + $0x44] sm:$0x1]  ;;  %v3962_v43 = vld [vmem:[%s3744_s9 + $0x48] sm:$0xf] }
  0x3d   : > { %v3041_v61 = vrot.slane %v2907_v39, 9  ;;  %v1357_v63 = vrot.slane %v1356_v48, 4  ;;  %v454_v17 = vrot.slane %v452_v52, 5  ;;  %v1643_v4 = vrot.slane %v3762_v15, 5  ;;  %v2908_v15 = vld [vmem:[%s3744_s9 + $0x18] sm:$0xe] }
  0x3e   : > { %3250 = vmatmul.mubr.msk.bf16.gmra.mrb[4].mxu1 %vm554_vm3, %v2953_v36  ;;  %v457_v5 = vshrl.u32 %v3926_v45, 16  ;;  %v440_v9 = vrot.slane %v439_v55, 4  ;;  %v449_v10 = vor.u32 %v448_v58, %v444_v49  ;;  %v460_v13 = vshll.u32 %v3926_v45, 16 }
  0x3f   : > { %v466_v19 = vshll.u32 %v3930_v53, 16  ;;  %v1362_v20 = vsel %vm3781_vm4, %v1357_v63, %v1361_v35  ;;  %v1644_v21 = vsel %vm3936_vm7, %v3041_v61, %v1643_v4  ;;  %v1645_v23 = vrot.slane %v1643_v4, 4  ;;  %v3978_v63 = vld [vmem:[%s3744_s9 + $0x50] sm:$0x1] }
  0x40   : > { %v459_v24 = vrot.slane %v457_v5, 4  ;;  %v3028_v28 = vcombine.low %v1352_v54, %v1362_v20  ;;  %v445_v33 = vsel %vm3781_vm4, %v440_v9, %v444_v49  ;;  %v450_v37 = vrot.slane %v449_v10, 4 }
  0x41   : > { %v462_v38 = vrot.slane %v460_v13, 5  ;;  %v1647_v39 = vsel %vm3936_vm7, %v1645_v23, %v1646_v62  ;;  %v468_v40 = vrot.slane %v466_v19, 5  ;;  %v470_v35 = vshrl.u32 %v3930_v53, 16  ;;  %v3993_v23 = vld [vmem:[%s3744_s9 + $0x54] sm:$0xf] }
  0x42   : > { %v476_v41 = vshll.u32 %v3944_v12, 16  ;;  %3322 = vmatmul.mubr.msk.bf16.gmra.mrb[4].mxu0 %vm554_vm3, %v3028_v28  ;;  %v455_v44 = vsel %vm3781_vm4, %v450_v37, %v454_v17  ;;  %v3050_v36 = vcombine.low %v1644_v21, %v1647_v39  ;;  %v3042_v49 = vrot.slane %v2908_v15, 9  ;;  %v3999_v39 = vld [vmem:[%s3744_s9 + $0x58] sm:$0xf] }
  0x43   : > { %v463_v48 = vor.u32 %v462_v38, %v459_v24  ;;  %v2954_v62 = vcombine.low %v445_v33, %v455_v44  ;;  %v472_v52 = vrot.slane %v470_v35, 4  ;;  %v1652_v55 = vrot.slane %v1650_v26, 4  ;;  %v4004_v44 = vld [vmem:[%s3744_s9 + $0x5c] sm:$0x1] }
  0x44   : > { %v478_v54 = vrot.slane %v476_v41, 5  ;;  %3335 = vmatprep.mubr.msk.bf16.mxu0 %vm554_vm3, %v3050_v36  ;;  %v1651_v61 = vsel %vm3936_vm7, %v3042_v49, %v1650_v26  ;;  %v481_v17 = vshrl.u32 %v3962_v43, 16  ;;  %v484_v4 = vshll.u32 %v3962_v43, 16  ;;  %v2909_v26 = vld [vmem:[%s3744_s9 + $0x24] sm:$0xe] }
  0x45   : > { %v464_v58 = vrot.slane %v463_v48, 4  ;;  %3253 = vmatprep.mubr.msk.bf16.mxu1 %vm554_vm3, %v2954_v62  ;;  %v473_v5 = vor.u32 %v472_v52, %v468_v40  ;;  %v1654_v9 = vsel %vm3936_vm7, %v1652_v55, %v1653_v34  ;;  %v490_v10 = vshll.u32 %v3968_v16, 16  ;;  %v4010_v48 = vld [vmem:[%s4735_s1 + $0xe] sm:$0x3] }
  0x46   : > { %v494_v60 = vshrl.u32 %v3968_v16, 16  ;;  %v3051_v19 = vcombine.low %v1651_v61, %v1654_v9  ;;  %v483_v20 = vrot.slane %v481_v17, 4  ;;  %v486_v21 = vrot.slane %v484_v4, 5  ;;  %v2910_v61 = vld [vmem:[%s3744_s9 + $0x30] sm:$0xe] }
  0x47   : > { %v469_v13 = vsel %vm3781_vm4, %v464_v58, %v468_v40  ;;  %v474_v24 = vrot.slane %v473_v5, 4  ;;  %v492_v0 = vrot.slane %v490_v10, 5  ;;  %v500_v34 = vshll.u32 %v3978_v63, 16  ;;  %v2911_v9 = vld [vmem:[%s3744_s9 + $0x3c] sm:$0xe] }
  0x48   : > { %v496_v15 = vrot.slane %v494_v60, 4  ;;  %v487_v28 = vor.u32 %v486_v21, %v483_v20  ;;  %v3043_v33 = vrot.slane %v2909_v26, 9  ;;  %v1657_v37 = vrot.slane %v3854_v51, 5  ;;  %v4035_v20 = vld [vmem:[%s3744_s9 + $0x44] sm:$0x1] }
  0x49   : > { %v1660_v38 = vrot.slane %v3858_v57, 5  ;;  %v479_v40 = vsel %vm3781_vm4, %v474_v24, %v478_v54  ;;  %v502_v41 = vrot.slane %v500_v34, 5  ;;  %v505_v36 = vshrl.u32 %v3993_v23, 16  ;;  %4750 = vst [vmem:[#allocation2_spill] sm:$0xff] %v4035_v20 }
  0x4a   : > { %v497_v35 = vor.u32 %v496_v15, %v492_v0  ;;  %v2955_v51 = vcombine.low %v469_v13, %v479_v40  ;;  %3336 = vmatmul.mubr.msk.bf16.vlgmr.msra.gmra.mrb[0].mxu0 %vm554_vm3, %v3051_v19  ;;  %v488_v57 = vrot.slane %v487_v28, 4  ;;  %v1658_v49 = vsel %vm3936_vm7, %v3043_v33, %v1657_v37  ;;  %v4032_v19 = vld [vmem:[%s3744_s9 + $0x40] sm:$0xf] }
  0x4b   : > { %v1659_v62 = vrot.slane %v1657_v37, 4  ;;  %3352 = vmatpush3.bf16.msra.mxu0 %v3818_v1  ;;  %v507_v54 = vrot.slane %v505_v36, 4  ;;  %v508_v55 = vshll.u32 %v3993_v23, 16  ;;  %v514_v58 = vshll.u32 %v3999_v39, 16 }
  0x4c   : > { %v498_v52 = vrot.slane %v497_v35, 4  ;;  %3254 = vmatmul.mubr.msk.bf16.gmra.mrb[8].mxu1 %vm554_vm3, %v2955_v51  ;;  %v493_v17 = vsel %vm3781_vm4, %v488_v57, %v492_v0  ;;  %v518_v5 = vshrl.u32 %v3999_v39, 16  ;;  %v524_v1 = vshll.u32 %v4004_v44, 16  ;;  %3543 = vmatprep.subr.msk.bf16.mxu0 %vm579_vm0, %v4010_v48 }
  0x4d   : > { %v1661_v4 = vsel %vm3936_vm7, %v1659_v62, %v1660_v38  ;;  %v510_v26 = vrot.slane %v508_v55, 5  ;;  %v516_v13 = vrot.slane %v514_v58, 5  ;;  %v3044_v0 = vrot.slane %v2910_v61, 9  ;;  %v4056_v55 = vld [vmem:[%s3744_s9 + $0x50] sm:$0x1] }
  0x4e   : > { %v503_v10 = vsel %vm3781_vm4, %v498_v52, %v502_v41  ;;  %v3052_v60 = vcombine.low %v1658_v49, %v1661_v4  ;;  %v520_v24 = vrot.slane %v518_v5, 4  ;;  %v1664_v34 = vrot.slane %v3890_v47, 5  ;;  %v2912_v49 = vld [vmem:[%s3744_s9 + $0x48] sm:$0xe]  ;;  %v2913_v58 = vld [vmem:[%s3744_s9 + $0x54] sm:$0xe] }
  0x4f   : > { %v2956_v21 = vcombine.low %v493_v17, %v503_v10  ;;  %v511_v15 = vor.u32 %v510_v26, %v507_v54  ;;  %v1667_v28 = vrot.slane %v3899_v56, 5  ;;  %v3045_v33 = vrot.slane %v2911_v9, 9  ;;  %v4053_v54 = vld [vmem:[%s3744_s9 + $0x4c] sm:$0xf]  ;;  %v4069_v9 = vld [vmem:[%s3744_s9 + $0x5c] sm:$0x1] }
  0x50   : > { %3339 = vmatprep.mubr.msk.bf16.mxu0 %vm554_vm3, %v3052_v60  ;;  %v521_v37 = vor.u32 %v520_v24, %v516_v13  ;;  %v526_v38 = vrot.slane %v524_v1, 5  ;;  %v1671_v40 = vrot.slane %v4032_v19, 5  ;;  %v1674_v35 = vrot.slane %v4035_v20, 5  ;;  %v4066_v1 = vld [vmem:[%s3744_s9 + $0x58] sm:$0xf]  ;;  %4752 = vst [vmem:[#allocation4_spill] sm:$0xff] %v4069_v9 }
  0x51   : > { %3257 = vmatprep.mubr.msk.bf16.mxu1 %vm554_vm3, %v2956_v21  ;;  %v512_v41 = vrot.slane %v511_v15, 4  ;;  %v1665_v36 = vsel %vm3936_vm7, %v3044_v0, %v1664_v34  ;;  %v1666_v47 = vrot.slane %v1664_v34, 4  ;;  %v2966_v4 = vcombine.low %v3747_v6, %v3750_v7  ;;  %4751 = vst [vmem:[#allocation3_spill] sm:$0xff] %v4066_v1  ;;  %v2914_v34 = vld [vmem:[%s3744_s9 + $0x60] sm:$0xe] }
  0x52   : > { %v522_v56 = vrot.slane %v521_v37, 4  ;;  %v1672_v51 = vsel %vm3936_vm7, %v3045_v33, %v1671_v40  ;;  %v1673_v57 = vrot.slane %v1671_v40, 4  ;;  %v3046_v26 = vrot.slane %v2912_v49, 9  ;;  %v4086_v37 = vld [vmem:[%s3744_s9 + $0x68] sm:$0x1] }
  0x53   : > { %v517_v62 = vsel %vm3781_vm4, %v512_v41, %v516_v13  ;;  %v1668_v52 = vsel %vm3936_vm7, %v1666_v47, %v1667_v28  ;;  %v4072_v13 = vld [vmem:[%s3744_s9 + $0x64] sm:$0xf]  ;;  %v1678_v21 = vrot.slane %v4053_v54, 5  ;;  %v1681_v6 = vrot.slane %v4056_v55, 5  ;;  %4754 = vst [vmem:[#allocation6_spill] sm:$0xff] %v4086_v37 }
  0x54   : > { %v527_v61 = vsel %vm3781_vm4, %v522_v56, %v526_v38  ;;  %v3053_v17 = vcombine.low %v1665_v36, %v1668_v52  ;;  %v1675_v5 = vsel %vm3936_vm7, %v1673_v57, %v1674_v35  ;;  %4753 = vst [vmem:[#allocation5_spill] sm:$0xff] %v4072_v13  ;;  %v3047_v24 = vrot.slane %v2913_v58, 9  ;;  %v3007_v58 = vld [vmem:[%s4735_s1 + $0x6] sm:$0x3] }
  0x55   : > { %v2957_v10 = vcombine.low %v517_v62, %v527_v61  ;;  %v3054_v60 = vcombine.low %v1672_v51, %v1675_v5  ;;  %v1685_v0 = vrot.slane %v4066_v1, 5  ;;  %v1688_v15 = vrot.slane %v4069_v9, 5  ;;  %v253_v5 = vld [vmem:[%s3744_s9 + $0xc] sm:$0xe] }
  0x56   : > { %3340 = vmatmul.mubr.msk.bf16.gmra.mrb[4].mxu0 %vm554_vm3, %v3053_v17  ;;  %v1679_v28 = vsel %vm3936_vm7, %v3046_v26, %v1678_v21  ;;  %v1680_v33 = vrot.slane %v1678_v21, 4  ;;  %v1692_v38 = vrot.slane %v4072_v13, 5  ;;  %v2967_v41 = vcombine.low %v3774_v30, %v3777_v31  ;;  %v4124_v26 = vld [vmem:[%s4735_s1 + $0x10] sm:$0x3]  ;;  %v4355_v9 = vld [vmem:[%s3744_s9 + $0x6c] sm:$0xf] }
  0x57   : > { %3258 = vmatmul.mubr.msk.bf16.gmra.mrb[12].mxu1 %vm554_vm3, %v2957_v10  ;;  %3343 = vmatprep.mubr.msk.bf16.mxu0 %vm554_vm3, %v3054_v60  ;;  %v1686_v40 = vsel %vm3936_vm7, %v3047_v24, %v1685_v0  ;;  %v1687_v35 = vrot.slane %v1685_v0, 4  ;;  %v3048_v47 = vrot.slane %v2914_v34, 9  ;;  %v1695_v49 = vrot.slane %v4086_v37, 5  ;;  %v4358_v13 = vld [vmem:[%s3744_s9 + $0x70] sm:$0xf] }
  0x58   : > { %3263 = vmatprep.mubr.msk.bf16.mxu1 %vm554_vm3, %v2966_v4  ;;  %v1682_v36 = vsel %vm3936_vm7, %v1680_v33, %v1681_v6  ;;  %v1694_v57 = vrot.slane %v1692_v38, 4  ;;  %v2968_v62 = vcombine.low %v3824_v14, %v3829_v22  ;;  %v970_v30 = vsel %vm579_vm0, %v3850_v46, 0  ;;  %v2917_v46 = vld [vmem:[%s3744_s9 + $0x18] sm:$0xf]  ;;  %v4116_v4 = vld [vmem:[%s3744_s9 + $0x1c] sm:$0xf] }
  0x59   : > { %v3055_v56 = vcombine.low %v1679_v28, %v1682_v36  ;;  %v1689_v51 = vsel %vm3936_vm7, %v1687_v35, %v1688_v15  ;;  %v1693_v61 = vsel %vm3936_vm7, %v3048_v47, %v1692_v38  ;;  %v872_v17 = vrot.slane %v3777_v31, 5 }
  0x5a   : > { %v3056_v52 = vcombine.low %v1686_v40, %v1689_v51  ;;  %v1696_v14 = vsel %vm3936_vm7, %v1694_v57, %v1695_v49  ;;  %v875_v10 = vrot.slane %v3789_v42, 5  ;;  %v2969_v31 = vcombine.low %v3863_v2, %v3873_v18  ;;  %v254_v2 = vld [vmem:[%s3744_s9 + $0x18] sm:$0xe]  ;;  %v4150_v40 = vld [vmem:[%s3744_s9 + $0x30] sm:$0xf] }
  0x5b   : > { %v3057_v60 = vcombine.low %v1693_v61, %v1696_v14  ;;  %v3067_v21 = vcombine.low %v2917_v46, %v4116_v4  ;;  %v2046_v6 = vshrl.u32 %v2917_v46, 16  ;;  %v2970_v24 = vcombine.low %v3902_v59, %v3908_v11  ;;  %v4144_v59 = vld [vmem:[%s3744_s9 + $0x24] sm:$0xf]  ;;  %v4168_v51 = vld [vmem:[%s3744_s9 + $0x34] sm:$0xf] }
  0x5c   : > { %v2288_v42 = vsel %vm579_vm0, %v4010_v48, 0  ;;  %v2983_v0 = vrot.slane %v253_v5, 9  ;;  %v874_v15 = vrot.slane %v872_v17, 4  ;;  %v868_v34 = vrot.slane %v3753_v8, 5  ;;  %v4147_v48 = vld [vmem:[%s3744_s9 + $0x28] sm:$0xf] }
  0x5d   : > { %v2049_v28 = vshll.u32 %v2917_v46, 16  ;;  %v4135_v33 = vsel %vm579_vm0, %v3007_v58, 0  ;;  %v4140_v38 = vsel %vm579_vm0, %v4124_v26, 0  ;;  %v4162_v36 = vrot.slane %v2046_v6, 4  ;;  %v255_v49 = vld [vmem:[%s3744_s9 + $0x24] sm:$0xe] }
  0x5e   : > { %3344 = vmatmul.mubr.msk.bf16.gmra.mrb[8].mxu0 %vm554_vm3, %v3055_v56  ;;  %v4154_v35 = vsel %vm3936_vm7, %v2983_v0, %v872_v17  ;;  %v2059_v47 = vshrl.u32 %v4116_v4, 16  ;;  %v2971_v56 = vcombine.low %v3926_v45, %v3930_v53  ;;  %v882_v61 = vrot.slane %v3836_v27, 5  ;;  %v4321_v57 = vld [vmem:[%s3744_s9 + $0x2c] sm:$0x1] }
  0x5f   : > { %3264 = vmatmul.mubr.msk.bf16.vlgmr.msra.gmra.mrb[0].mxu1 %vm554_vm3, %v2967_v41  ;;  %3347 = vmatprep.mubr.msk.bf16.mxu0 %vm554_vm3, %v3056_v52  ;;  %v4158_v41 = vsel %vm3936_vm7, %v874_v15, %v875_v10  ;;  %v865_v52 = vrot.slane %v3750_v7, 5  ;;  %v4178_v14 = vrot.slane %v2049_v28, 5  ;;  %v3068_v45 = vcombine.low %v4144_v59, %v4147_v48 }
  0x60   : > { %3280 = vmatpush3.bf16.msra.mxu1 %v970_v30  ;;  %3267 = vmatprep.mubr.msk.bf16.mxu1 %vm554_vm3, %v2968_v62  ;;  %v252_v62 = vld [vmem:[%s3744_s9] sm:$0xe]  ;;  %v2984_v30 = vrot.slane %v254_v2, 9  ;;  %v2070_v17 = vshrl.u32 %v4144_v59, 16  ;;  %v2073_v46 = vshll.u32 %v4144_v59, 16  ;;  %v2985_v10 = vrot.slane %v255_v49, 9 }
  0x61   : > { %3538 = vmatprep.subr.msk.bf16.mxu1 %vm579_vm0, %v3007_v58  ;;  %v879_v58 = vrot.slane %v3829_v22, 5  ;;  %v886_v22 = vrot.slane %v3873_v18, 5  ;;  %v2972_v27 = vcombine.low %v3962_v43, %v3968_v16  ;;  %v889_v6 = vrot.slane %v3880_v29, 5  ;;  %v4207_v2 = vld [vmem:[%s3744_s9 + $0x3c] sm:$0xf] }
  0x62   : > { %v4203_v28 = vrot.slane %v2070_v17, 4  ;;  %v2083_v43 = vshrl.u32 %v4147_v48, 16  ;;  %v2094_v49 = vshrl.u32 %v4150_v40, 16  ;;  %v2097_v17 = vshll.u32 %v4150_v40, 16 }
  0x63   : > { %v4186_v5 = vsel %vm3936_vm7, %v2984_v30, %v879_v58  ;;  %v881_v7 = vrot.slane %v879_v58, 4  ;;  %v4201_v15 = vsel %vm3936_vm7, %v2985_v10, %v886_v22  ;;  %v888_v18 = vrot.slane %v886_v22, 4  ;;  %v4288_v10 = vld [vmem:[%s3744_s9 + $0x64] sm:$0xf] }
  0x64   : > { %v893_v30 = vrot.slane %v3908_v11, 5  ;;  %v896_v58 = vrot.slane %v3917_v25, 5  ;;  %v2055_v22 = vshll.u32 %v4116_v4, 16 }
  0x65   : > { %v4197_v0 = vsel %vm3936_vm7, %v881_v7, %v882_v61  ;;  %v257_v61 = vld [vmem:[%s3744_s9 + $0x3c] sm:$0xe]  ;;  %v4224_v7 = vld [vmem:[%s3744_s9 + $0x40] sm:$0xf] }
  0x66   : > { %3348 = vmatmul.mubr.msk.bf16.gmra.mrb[12].mxu0 %vm554_vm3, %v3057_v60  ;;  %v256_v60 = vld [vmem:[%s3744_s9 + $0x30] sm:$0xe]  ;;  %v2987_v8 = vrot.slane %v257_v61, 9  ;;  %v4276_v61 = vld [vmem:[%s3744_s9 + $0x58] sm:$0xf]  ;;  %v2131_v37 = vshrl.u32 %v4224_v7, 16 }
  0x67   : > { %3268 = vmatmul.mubr.msk.bf16.gmra.mrb[4].mxu1 %vm554_vm3, %v2969_v31  ;;  %3353 = vmatprep.mubr.msk.bf16.mxu0 %vm554_vm3, %v3067_v21  ;;  %v3069_v31 = vcombine.low %v4150_v40, %v4168_v51  ;;  %v2982_v21 = vrot.slane %v252_v62, 9  ;;  %v2986_v59 = vrot.slane %v256_v60, 9  ;;  %v4215_v62 = vsel %vm3936_vm7, %v888_v18, %v889_v6  ;;  %v4241_v40 = vld [vmem:[%s3744_s9 + $0x4c] sm:$0xf]  ;;  %v258_v18 = vld [vmem:[%s3744_s9 + $0x48] sm:$0xe] }
  0x68   : > { %3271 = vmatprep.mubr.msk.bf16.mxu1 %vm554_vm3, %v2970_v24  ;;  %v867_v24 = vrot.slane %v865_v52, 4  ;;  %v895_v60 = vrot.slane %v893_v30, 4 }
  0x69   : > { %v866_v11 = vsel %vm3936_vm7, %v2982_v21, %v865_v52  ;;  %v4252_v52 = vrot.slane %v2073_v46, 5  ;;  %v3070_v21 = vcombine.low %v4207_v2, %v4224_v7 }
  0x6a   : > { %v869_v25 = vsel %vm3936_vm7, %v867_v24, %v868_v34  ;;  %v900_v34 = vrot.slane %v3930_v53, 5  ;;  %v4258_v6 = vsel %vm3936_vm7, %v895_v60, %v896_v58  ;;  %v4261_v24 = vld [vmem:[%s3744_s9 + $0x20] sm:$0x1]  ;;  %v4293_v53 = vrot.slane %v2094_v49, 4 }
  0x6b   : > { %v2991_v58 = vcombine.low %v866_v11, %v869_v25  ;;  %v2988_v11 = vrot.slane %v258_v18, 9  ;;  %v907_v25 = vrot.slane %v3968_v16, 5  ;;  %v2103_v49 = vshll.u32 %v4168_v51, 16 }
  0x6c   : > { %v902_v60 = vrot.slane %v900_v34, 4 }
  0x6d   : > { %v909_v18 = vrot.slane %v907_v25, 4 }
  0x6e   : > { %3354 = vmatmul.mubr.msk.bf16.vlgmr.msra.gmra.mrb[0].mxu0 %vm554_vm3, %v3068_v45 }
  0x6f   : > { %3272 = vmatmul.mubr.msk.bf16.gmra.mrb[8].mxu1 %vm554_vm3, %v2971_v56  ;;  %3370 = vmatpush3.bf16.msra.mxu0 %v2288_v42  ;;  %v4238_v42 = vld [vmem:[%s3744_s9 + $0x48] sm:$0xf]  ;;  %v4245_v56 = vsel %vm3936_vm7, %v2986_v59, %v893_v30  ;;  %v4271_v59 = vld [vmem:[%s3744_s9 + $0x54] sm:$0xf]  ;;  %v2065_v30 = vshll.u32 %v4261_v24, 16 }
  0x70   : > { %3275 = vmatprep.mubr.msk.bf16.mxu1 %vm554_vm3, %v2972_v27  ;;  %3357 = vmatprep.mubr.msk.bf16.mxu0 %vm554_vm3, %v3069_v31  ;;  %v4247_v27 = vrot.slane %v2055_v22, 5  ;;  %v2061_v31 = vrot.slane %v2059_v47, 4  ;;  %v903_v47 = vrot.slane %v3944_v12, 5  ;;  %v3071_v46 = vcombine.low %v4238_v42, %v4241_v40  ;;  %v4279_v22 = vld [vmem:[%s3744_s9 + $0x60] sm:$0xf] }
  0x71   : > { %3544 = vmatprep.subr.msk.bf16.mxu0 %vm579_vm0, %v4124_v26  ;;  %v2973_v26 = vcombine.low %v3993_v23, %v3999_v39  ;;  %v2052_v12 = vor.u32 %v4178_v14, %v4162_v36  ;;  %v4285_v23 = vsel %vm3936_vm7, %v2987_v8, %v900_v34  ;;  %v2079_v14 = vshll.u32 %v4147_v48, 16 }
  0x72   : > { %v2062_v29 = vor.u32 %v2061_v31, %v4247_v27  ;;  %v4298_v36 = vsel %vm3936_vm7, %v902_v60, %v903_v47  ;;  %v910_v8 = vrot.slane %v3978_v63, 5  ;;  %v2099_v34 = vrot.slane %v2097_v17, 5 }
  0x73   : > { %v2121_v31 = vshll.u32 %v4207_v2, 16  ;;  %v3072_v16 = vcombine.low %v4271_v59, %v4276_v61  ;;  %v3073_v63 = vcombine.low %v4279_v22, %v4288_v10  ;;  %v2053_v17 = vrot.slane %v2052_v12, 4 }
  0x74   : > { %v4315_v47 = vsel %vm3936_vm7, %v2988_v11, %v907_v25  ;;  %v2085_v60 = vrot.slane %v2083_v43, 4  ;;  %v4327_v12 = vsel %vm3936_vm7, %v909_v18, %v910_v8  ;;  %v914_v11 = vrot.slane %v3999_v39, 5  ;;  %v4340_v18 = vld [vmem:[%s3744_s9 + $0x38] sm:$0x1] }
  0x75   : > { %v4755_v43 = vshrl.u32 %v4168_v51, 16  ;;  %v2142_v8 = vshrl.u32 %v4238_v42, 16 }
  0x76   : > { %3358 = vmatmul.mubr.msk.bf16.gmra.mrb[4].mxu0 %vm554_vm3, %v3070_v21  ;;  %v259_v21 = vld [vmem:[%s3744_s9 + $0x54] sm:$0xe] }
  0x77   : > { %3276 = vmatmul.mubr.msk.bf16.gmra.mrb[12].mxu1 %vm554_vm3, %v2973_v26  ;;  %3361 = vmatprep.mubr.msk.bf16.mxu0 %vm554_vm3, %v3071_v46  ;;  %v2063_v26 = vrot.slane %v2062_v29, 4  ;;  %v2067_v46 = vrot.slane %v2065_v30, 5  ;;  %v2989_v45 = vrot.slane %v259_v21, 9  ;;  %v4332_v30 = vrot.slane %v2103_v49, 5 }
  0x78   : > { %3281 = vmatprep.mubr.msk.bf16.mxu1 %vm554_vm3, %v2991_v58  ;;  %v4323_v58 = vrot.slane %v2079_v14, 5  ;;  %v2109_v25 = vrot.slane %v4755_v43, 4  ;;  %v917_v14 = vrot.slane %v4004_v44, 5  ;;  %v916_v21 = vrot.slane %v914_v11, 4 }
  0x79   : > { %v4344_v39 = vsel %vm3936_vm7, %v2989_v45, %v914_v11  ;;  %v2145_v29 = vshll.u32 %v4238_v42, 16  ;;  %v2058_v49 = vsel %vm3781_vm4, %v2053_v17, %v4247_v27  ;;  %v2076_v44 = vor.u32 %v4252_v52, %v4203_v28 }
  0x7a   : > { %v2089_v43 = vshll.u32 %v4321_v57, 16  ;;  %v2068_v45 = vsel %vm3781_vm4, %v2063_v26, %v2067_v46  ;;  %v2086_v42 = vor.u32 %v2085_v60, %v4323_v58  ;;  %v2100_v11 = vor.u32 %v2099_v34, %v4293_v53 }
  0x7b   : > { %v4366_v27 = vsel %vm3936_vm7, %v916_v21, %v917_v14  ;;  %v4756_v28 = vcombine.low %v4154_v35, %v4158_v41  ;;  %v2110_v52 = vor.u32 %v2109_v25, %v4332_v30  ;;  %v2127_v53 = vshll.u32 %v4224_v7, 16 }
  0x7c   : > { %v4757_v34 = vshrl.u32 %v4207_v2, 16  ;;  %v2123_v46 = vrot.slane %v2121_v31, 5  ;;  %v2155_v60 = vshrl.u32 %v4241_v40, 16  ;;  %v4758_v35 = vcombine.low %v4186_v5, %v4197_v0  ;;  %v3610_v31 = vld [vmem:[%s4735_s1 + $0x8] sm:$0x3] }
  0x7d   : > { %v2151_v41 = vshll.u32 %v4241_v40, 16  ;;  %v2147_v25 = vrot.slane %v2145_v29, 5  ;;  %v3074_v14 = vcombine.low %v4355_v9, %v4358_v13  ;;  %v2077_v2 = vrot.slane %v2076_v44, 4 }
  0x7e   : > { %3362 = vmatmul.mubr.msk.bf16.gmra.mrb[8].mxu0 %vm554_vm3, %v3072_v16  ;;  %v2113_v16 = vshll.u32 %v4340_v18, 16  ;;  %v2120_v26 = vrot.slane %v4757_v34, 4  ;;  %v2087_v21 = vrot.slane %v2086_v42, 4  ;;  %v2091_v5 = vrot.slane %v2089_v43, 5 }
  0x7f   : > { %3282 = vmatmul.mubr.msk.bf16.vlgmr.msra.gmra.mrb[0].mxu1 %vm554_vm3, %v4756_v28  ;;  %3365 = vmatprep.mubr.msk.bf16.mxu0 %vm554_vm3, %v3073_v63  ;;  %v2144_v63 = vrot.slane %v2142_v8, 4  ;;  %v2101_v0 = vrot.slane %v2100_v11, 4  ;;  %v2111_v28 = vrot.slane %v2110_v52, 4  ;;  %v4396_v29 = vrot.slane %v2127_v53, 5  ;;  %v4409_v11 = vld [vmem:[%s3744_s9 + $0x50] sm:$0x1] }
  0x80   : > { %3298 = vmatpush3.bf16.msra.mxu1 %v4135_v33  ;;  %3285 = vmatprep.mubr.msk.bf16.mxu1 %vm554_vm3, %v4758_v35  ;;  %v3084_v33 = vcombine.low %v2058_v49, %v2068_v45  ;;  %v2115_v34 = vrot.slane %v2113_v16, 5  ;;  %v4394_v35 = vld [vmem:[%s3744_s9 + $0x44] sm:$0x1]  ;;  %v2133_v8 = vrot.slane %v2131_v37, 4  ;;  %v2166_v44 = vshrl.u32 %v4271_v59, 16 }
  0x81   : > { %3540 = vmatprep.subr.msk.bf16.mxu1 %vm579_vm0, %v3610_v31  ;;  %v2169_v17 = vshll.u32 %v4271_v59, 16  ;;  %v4400_v1 = vrot.slane %v2151_v41, 5  ;;  %v2157_v20 = vrot.slane %v2155_v60, 4  ;;  %v2179_v49 = vshrl.u32 %v4276_v61, 16 }
  0x82   : > { %v2190_v45 = vshrl.u32 %v4279_v22, 16  ;;  %v2193_v43 = vshll.u32 %v4279_v22, 16  ;;  %v2082_v42 = vsel %vm3781_vm4, %v2077_v2, %v4323_v58  ;;  %v2092_v37 = vsel %vm3781_vm4, %v2087_v21, %v2091_v5 }
  0x83   : > { %v2106_v59 = vsel %vm3781_vm4, %v2101_v0, %v4332_v30  ;;  %v2124_v52 = vor.u32 %v2123_v46, %v2120_v26  ;;  %v2137_v16 = vshll.u32 %v4394_v35, 16  ;;  %v4759_v22 = vcombine.low %v4201_v15, %v4215_v62 }
  0x84   : > { %v2116_v58 = vsel %vm3781_vm4, %v2111_v28, %v2115_v34  ;;  %v2134_v53 = vor.u32 %v2133_v8, %v4396_v29  ;;  %v2148_v60 = vor.u32 %v2147_v25, %v2144_v63  ;;  %v2175_v41 = vshll.u32 %v4276_v61, 16 }
  0x85   : > { %v2203_v30 = vshrl.u32 %v4288_v10, 16  ;;  %v4760_v26 = vcombine.low %v4245_v56, %v4258_v6  ;;  %v2158_v15 = vor.u32 %v2157_v20, %v4400_v1  ;;  %v2161_v62 = vshll.u32 %v4409_v11, 16  ;;  %v4436_v56 = vld [vmem:[%s3744_s9 + $0x5c] sm:$0x1] }
  0x86   : > { %3366 = vmatmul.mubr.msk.bf16.gmra.mrb[12].mxu0 %vm554_vm3, %v3074_v14  ;;  %v2199_v46 = vshll.u32 %v4288_v10, 16  ;;  %v2168_v14 = vrot.slane %v2166_v44, 4  ;;  %v2171_v2 = vrot.slane %v2169_v17, 5  ;;  %v2192_v31 = vrot.slane %v2190_v45, 4 }
  0x87   : > { %3286 = vmatmul.mubr.msk.bf16.gmra.mrb[4].mxu1 %vm554_vm3, %v4759_v22  ;;  %3371 = vmatprep.mubr.msk.bf16.mxu0 %vm554_vm3, %v3084_v33  ;;  %v2195_v63 = vrot.slane %v2193_v43, 5  ;;  %v3085_v25 = vcombine.low %v2082_v42, %v2092_v37  ;;  %v3086_v33 = vcombine.low %v2106_v59, %v2116_v58  ;;  %v2125_v21 = vrot.slane %v2124_v52, 4  ;;  %v4445_v43 = vld [vmem:[%s3744_s9 + $0x68] sm:$0x1] }
  0x88   : > { %3289 = vmatprep.mubr.msk.bf16.mxu1 %vm554_vm3, %v4760_v26  ;;  %v2139_v5 = vrot.slane %v2137_v16, 5  ;;  %v2135_v0 = vrot.slane %v2134_v53, 4  ;;  %v2149_v28 = vrot.slane %v2148_v60, 4  ;;  %v4438_v6 = vrot.slane %v2175_v41, 5  ;;  %v4475_v60 = vld [vmem:[%s3744_s9 + $0x48] sm:$0xf] }
  0x89   : > { %v2181_v20 = vrot.slane %v2179_v49, 4  ;;  %v2159_v34 = vrot.slane %v2158_v15, 4  ;;  %v2163_v8 = vrot.slane %v2161_v62, 5  ;;  %v4440_v22 = vrot.slane %v2199_v46, 5 }
  0x8a   : > { %v2205_v44 = vrot.slane %v2203_v30, 4  ;;  %v2214_v17 = vshrl.u32 %v4355_v9, 16  ;;  %v2217_v45 = vshll.u32 %v4355_v9, 16  ;;  %v2227_v42 = vshrl.u32 %v4358_v13, 16 }
  0x8b   : > { %v2130_v49 = vsel %vm3781_vm4, %v2125_v21, %v4396_v29  ;;  %v2172_v37 = vor.u32 %v2171_v2, %v2168_v14  ;;  %v2185_v59 = vshll.u32 %v4436_v56, 16  ;;  %v4761_v52 = vcombine.low %v4285_v23, %v4298_v36  ;;  %v3612_v21 = vld [vmem:[%s3744_s9 + $0x10] sm:$0xf] }
  0x8c   : > { %v2140_v9 = vsel %vm3781_vm4, %v2135_v0, %v2139_v5  ;;  %v2154_v16 = vsel %vm3781_vm4, %v2149_v28, %v4400_v1  ;;  %v2182_v58 = vor.u32 %v2181_v20, %v4438_v6  ;;  %v2223_v29 = vshll.u32 %v4358_v13, 16 }
  0x8d   : > { %v4762_v53 = vcombine.low %v4315_v47, %v4327_v12  ;;  %v2196_v23 = vor.u32 %v2195_v63, %v2192_v31  ;;  %v2206_v36 = vor.u32 %v2205_v44, %v4440_v22  ;;  %v2209_v1 = vshll.u32 %v4445_v43, 16  ;;  %v4481_v31 = vld [vmem:[%s3744_s9 + $0x74] sm:$0x1] }
  0x8e   : > { %3372 = vmatmul.mubr.msk.bf16.vlgmr.msra.gmra.mrb[0].mxu0 %vm554_vm3, %v3085_v25  ;;  %v1397_v41 = vshll.u32 %v4053_v54, 16  ;;  %v2216_v47 = vrot.slane %v2214_v17, 4  ;;  %v1388_v12 = vshrl.u32 %v4475_v60, 16  ;;  %v1391_v30 = vshll.u32 %v4475_v60, 16 }
  0x8f   : > { %3290 = vmatmul.mubr.msk.bf16.gmra.mrb[8].mxu1 %vm554_vm3, %v4761_v52  ;;  %3388 = vmatpush3.bf16.msra.mxu0 %v4140_v38  ;;  %v2164_v38 = vsel %vm3781_vm4, %v2159_v34, %v2163_v8  ;;  %v2219_v26 = vrot.slane %v2217_v45, 5  ;;  %v3087_v15 = vcombine.low %v2130_v49, %v2140_v9  ;;  %v2173_v62 = vrot.slane %v2172_v37, 4  ;;  %v2941_v52 = vld [vmem:[%s3744_s9 + $0x18] sm:$0xe] }
  0x90   : > { %3293 = vmatprep.mubr.msk.bf16.mxu1 %vm554_vm3, %v4762_v53  ;;  %3375 = vmatprep.mubr.msk.bf16.mxu0 %vm554_vm3, %v3086_v33  ;;  %v2187_v46 = vrot.slane %v2185_v59, 5  ;;  %v3088_v14 = vcombine.low %v2154_v16, %v2164_v38  ;;  %v2183_v2 = vrot.slane %v2182_v58, 4  ;;  %v4483_v63 = vrot.slane %v2223_v29, 5  ;;  %v3611_v33 = vld [vmem:[%s3744_s9 + $0xc] sm:$0xf] }
  0x91   : > { %v2229_v25 = vrot.slane %v2227_v42, 4  ;;  %v3008_v5 = vcombine.low %v3611_v33, %v3612_v21  ;;  %v2197_v0 = vrot.slane %v2196_v23, 4  ;;  %v2207_v28 = vrot.slane %v2206_v36, 4  ;;  %v3613_v29 = vld [vmem:[%s3744_s9 + $0x18] sm:$0xf] }
  0x92   : > { %v2211_v20 = vrot.slane %v2209_v1, 5  ;;  %v1401_v34 = vshrl.u32 %v4053_v54, 16  ;;  %v1390_v8 = vrot.slane %v1388_v12, 4  ;;  %v1393_v44 = vrot.slane %v1391_v30, 5  ;;  %v3614_v53 = vld [vmem:[%s3744_s9 + $0x1c] sm:$0xf] }
  0x93   : > { %v2220_v17 = vor.u32 %v2219_v26, %v2216_v47  ;;  %v2233_v45 = vshll.u32 %v4481_v31, 16  ;;  %v4763_v42 = vcombine.low %v4344_v39, %v4366_v27  ;;  %v2178_v49 = vsel %vm3781_vm4, %v2173_v62, %v4438_v6  ;;  %v3616_v62 = vld [vmem:[%s3744_s9 + $0x28] sm:$0xf] }
  0x94   : > { %v2188_v37 = vsel %vm3781_vm4, %v2183_v2, %v2187_v46  ;;  %v2230_v59 = vor.u32 %v2229_v25, %v4483_v63  ;;  %v2421_v9 = vrot.slane %v4116_v4, 5  ;;  %v1399_v16 = vrot.slane %v1397_v41, 5 }
  0x95   : > { %v2202_v39 = vsel %vm3781_vm4, %v2197_v0, %v4440_v22  ;;  %v2212_v27 = vsel %vm3781_vm4, %v2207_v28, %v2211_v20  ;;  %v1403_v6 = vrot.slane %v1401_v34, 4  ;;  %v1407_v58 = vshll.u32 %v4056_v55, 16  ;;  %v2891_v22 = vld [vmem:[%s3744_s9 + $0x3c] sm:$0xf]  ;;  %v3617_v34 = vld [vmem:[%s3744_s9 + $0x30] sm:$0xf] }
  0x96   : > { %3376 = vmatmul.mubr.msk.bf16.gmra.mrb[4].mxu0 %vm554_vm3, %v3087_v15  ;;  %v3009_v38 = vcombine.low %v3613_v29, %v3614_v53  ;;  %v1394_v4 = vor.u32 %v1393_v44, %v1390_v8  ;;  %v3089_v23 = vcombine.low %v2178_v49, %v2188_v37  ;;  %v2221_v36 = vrot.slane %v2220_v17, 4  ;;  %v3615_v15 = vld [vmem:[%s3744_s9 + $0x24] sm:$0xf]  ;;  %v3618_v8 = vld [vmem:[%s3744_s9 + $0x34] sm:$0xf] }
  0x97   : > { %3294 = vmatmul.mubr.msk.bf16.gmra.mrb[12].mxu1 %vm554_vm3, %v4763_v42  ;;  %3379 = vmatprep.mubr.msk.bf16.mxu0 %vm554_vm3, %v3088_v14  ;;  %v2235_v1 = vrot.slane %v2233_v45, 5  ;;  %v3100_v41 = vrot.slane %v2941_v52, 9  ;;  %v3090_v47 = vcombine.low %v2202_v39, %v2212_v27  ;;  %v2231_v12 = vrot.slane %v2230_v59, 4  ;;  %v2943_v17 = vld [vmem:[%s3744_s9 + $0x30] sm:$0xe] }
  0x98   : > { %3299 = vmatprep.mubr.msk.bf16.mxu1 %vm554_vm3, %v3008_v5  ;;  %v2423_v30 = vrot.slane %v2421_v9, 4  ;;  %v2424_v26 = vrot.slane %v4261_v24, 5  ;;  %v3010_v46 = vcombine.low %v3615_v15, %v3616_v62  ;;  %v1364_v14 = vshrl.u32 %v2891_v22, 16  ;;  %v2942_v24 = vld [vmem:[%s3744_s9 + $0x24] sm:$0xe] }
  0x99   : > { %v1367_v55 = vshll.u32 %v2891_v22, 16  ;;  %v1395_v2 = vrot.slane %v1394_v4, 4  ;;  %v1409_v25 = vrot.slane %v1407_v58, 5  ;;  %v2226_v33 = vsel %vm3781_vm4, %v2221_v36, %v4483_v63  ;;  %v2945_v62 = vld [vmem:[%s3744_s9 + $0x48] sm:$0xe] }
  0x9a   : > { %v2422_v21 = vsel %vm3936_vm7, %v3100_v41, %v2421_v9  ;;  %v2428_v5 = vrot.slane %v4147_v48, 5  ;;  %v2236_v0 = vsel %vm3781_vm4, %v2231_v12, %v2235_v1  ;;  %v2425_v28 = vsel %vm3936_vm7, %v2423_v30, %v2424_v26  ;;  %v2944_v41 = vld [vmem:[%s3744_s9 + $0x3c] sm:$0xe]  ;;  %v4764_v26 = vld [vmem:[#allocation2_spill] sm:$0xff] }
  0x9b   : > { %v2435_v20 = vrot.slane %v4168_v51, 5  ;;  %v1404_v63 = vor.u32 %v1403_v6, %v1399_v16  ;;  %v3011_v48 = vcombine.low %v3617_v34, %v3618_v8  ;;  %v1366_v44 = vrot.slane %v1364_v14, 4 }
  0x9c   : > { %v1373_v45 = vshll.u32 %v4032_v19, 16  ;;  %v1377_v42 = vshrl.u32 %v4032_v19, 16  ;;  %v1369_v49 = vrot.slane %v1367_v55, 5  ;;  %v3101_v37 = vrot.slane %v2942_v24, 9  ;;  %v4765_v55 = vld [vmem:[#allocation3_spill] sm:$0xff] }
  0x9d   : > { %v1400_v59 = vsel %vm3781_vm4, %v1395_v2, %v1399_v16  ;;  %v1405_v51 = vrot.slane %v1404_v63, 4  ;;  %v3091_v52 = vcombine.low %v2226_v33, %v2236_v0  ;;  %v3109_v9 = vcombine.low %v2422_v21, %v2425_v28 }
  0x9e   : > { %3380 = vmatmul.mubr.msk.bf16.gmra.mrb[8].mxu0 %vm554_vm3, %v3089_v23  ;;  %v2431_v39 = vrot.slane %v4321_v57, 5  ;;  %v3102_v27 = vrot.slane %v2943_v17, 9  ;;  %v2437_v6 = vrot.slane %v2435_v20, 4  ;;  %v2438_v58 = vrot.slane %v4340_v18, 5 }
  0x9f   : > { %3300 = vmatmul.mubr.msk.bf16.vlgmr.msra.gmra.mrb[0].mxu1 %vm554_vm3, %v3009_v38  ;;  %3383 = vmatprep.mubr.msk.bf16.mxu0 %vm554_vm3, %v3090_v47  ;;  %v1410_v29 = vsel %vm3781_vm4, %v1405_v51, %v1409_v25  ;;  %v3012_v53 = vcombine.low %v2891_v22, %v4032_v19  ;;  %v4545_v38 = vrot.slane %v1373_v45, 5  ;;  %v1379_v16 = vrot.slane %v1377_v42, 4  ;;  %v2895_v19 = vld [vmem:[%s3744_s9 + $0x54] sm:$0xf] }
  0xa0   : > { %3406 = vmatpush3.bf16.msra.mxu1 %v3726_v3  ;;  %3303 = vmatprep.mubr.msk.bf16.mxu1 %vm554_vm3, %v3010_v46  ;;  %v2430_v3 = vrot.slane %v2428_v5, 4  ;;  %v4547_v4 = vcombine.low %v1400_v59, %v1410_v29  ;;  %v2429_v57 = vsel %vm3936_vm7, %v3101_v37, %v2428_v5  ;;  %v2442_v18 = vrot.slane %v4224_v7, 5  ;;  %v2897_v5 = vld [vmem:[%s3744_s9 + $0x60] sm:$0xf] }
  0xa1   : > { %v2436_v36 = vsel %vm3936_vm7, %v3102_v27, %v2435_v20  ;;  %v2439_v1 = vsel %vm3936_vm7, %v2437_v6, %v2438_v58  ;;  %v1370_v47 = vor.u32 %v1369_v49, %v1366_v44  ;;  %v2449_v12 = vrot.slane %v4241_v40, 5  ;;  %v2947_v27 = vld [vmem:[%s3744_s9 + $0x60] sm:$0xe] }
  0xa2   : > { %v2432_v23 = vsel %vm3936_vm7, %v2430_v3, %v2431_v39  ;;  %v3013_v7 = vcombine.low %v4475_v60, %v4053_v54  ;;  %v1412_v22 = vshrl.u32 %v2895_v19, 16  ;;  %v1380_v30 = vor.u32 %v1379_v16, %v4545_v38 }
  0xa3   : > { %v1383_v15 = vshll.u32 %v4764_v26, 16  ;;  %v3110_v46 = vcombine.low %v2429_v57, %v2432_v23  ;;  %v1415_v14 = vshll.u32 %v2895_v19, 16  ;;  %v1421_v2 = vshll.u32 %v4765_v55, 16  ;;  %v4767_v57 = vld [vmem:[#allocation4_spill] sm:$0xff] }
  0xa4   : > { %v1425_v25 = vshrl.u32 %v4765_v55, 16  ;;  %v3111_v33 = vcombine.low %v2436_v36, %v2439_v1  ;;  %v3103_v21 = vrot.slane %v2944_v41, 9  ;;  %v2444_v40 = vrot.slane %v2442_v18, 4 }
  0xa5   : > { %v2445_v24 = vrot.slane %v4394_v35, 5  ;;  %v1371_v0 = vrot.slane %v1370_v47, 4  ;;  %v3104_v54 = vrot.slane %v2945_v62, 9  ;;  %v2451_v60 = vrot.slane %v2449_v12, 4  ;;  %v4766_v35 = vld [vmem:[#allocation5_spill] sm:$0xff] }
  0xa6   : > { %3384 = vmatmul.mubr.msk.bf16.gmra.mrb[12].mxu0 %vm554_vm3, %v3091_v52  ;;  %v2452_v28 = vrot.slane %v4409_v11, 5  ;;  %v3014_v20 = vcombine.low %v2895_v19, %v4765_v55  ;;  %v1414_v63 = vrot.slane %v1412_v22, 4  ;;  %v1381_v34 = vrot.slane %v1380_v30, 4 }
  0xa7   : > { %3304 = vmatmul.mubr.msk.bf16.gmra.mrb[4].mxu1 %vm554_vm3, %v3011_v48  ;;  %3389 = vmatprep.mubr.msk.bf16.mxu0 %vm554_vm3, %v3109_v9  ;;  %v1385_v8 = vrot.slane %v1383_v15, 5  ;;  %v1417_v48 = vrot.slane %v1415_v14, 5  ;;  %v1436_v44 = vshrl.u32 %v2897_v5, 16  ;;  %v1423_v17 = vrot.slane %v1421_v2, 5  ;;  %v2946_v9 = vld [vmem:[%s3744_s9 + $0x54] sm:$0xe] }
  0xa8   : > { %3307 = vmatprep.mubr.msk.bf16.mxu1 %vm554_vm3, %v3012_v53  ;;  %v1427_v45 = vrot.slane %v1425_v25, 4  ;;  %v3015_v42 = vcombine.low %v2897_v5, %v4766_v35  ;;  %v1439_v49 = vshll.u32 %v2897_v5, 16  ;;  %v2443_v37 = vsel %vm3936_vm7, %v3103_v21, %v2442_v18 }
  0xa9   : > { %v2446_v11 = vsel %vm3936_vm7, %v2444_v40, %v2445_v24  ;;  %v1376_v59 = vsel %vm3781_vm4, %v1371_v0, %v4545_v38  ;;  %v2450_v51 = vsel %vm3936_vm7, %v3104_v54, %v2449_v12  ;;  %v2453_v52 = vsel %vm3936_vm7, %v2451_v60, %v2452_v28  ;;  %v2948_v40 = vld [vmem:[%s3744_s9 + $0x6c] sm:$0xe] }
  0xaa   : > { %v2456_v3 = vrot.slane %v4276_v61, 5  ;;  %v1386_v39 = vsel %vm3781_vm4, %v1381_v34, %v1385_v8  ;;  %v2463_v6 = vrot.slane %v4288_v10, 5  ;;  %v1445_v58 = vshll.u32 %v4766_v35, 16 }
  0xab   : > { %v1449_v29 = vshrl.u32 %v4766_v35, 16  ;;  %v1438_v53 = vrot.slane %v1436_v44, 4  ;;  %v1418_v38 = vor.u32 %v1417_v48, %v1414_v63  ;;  %v1428_v16 = vor.u32 %v1427_v45, %v1423_v17 }
  0xac   : > { %v1431_v23 = vshll.u32 %v4767_v57, 16  ;;  %v1441_v18 = vrot.slane %v1439_v49, 5  ;;  %v3112_v19 = vcombine.low %v2443_v37, %v2446_v11  ;;  %v3105_v61 = vrot.slane %v2946_v9, 9 }
  0xad   : > { %v2459_v36 = vrot.slane %v4436_v56, 5  ;;  %v3029_v1 = vcombine.low %v1376_v59, %v1386_v39  ;;  %v3113_v41 = vcombine.low %v2450_v51, %v2453_v52  ;;  %v2458_v47 = vrot.slane %v2456_v3, 4  ;;  %v4643_v52 = vld [vmem:[%s4736_s2] ss:$0 sm:$0xff] }
  0xae   : > { %3390 = vmatmul.mubr.msk.bf16.vlgmr.msra.gmra.mrb[0].mxu0 %vm554_vm3, %v3110_v46  ;;  %v3106_v12 = vrot.slane %v2947_v27, 9  ;;  %v2466_v10 = vrot.slane %v4445_v43, 5  ;;  %v1447_v22 = vrot.slane %v1445_v58, 5  ;;  %v1451_v30 = vrot.slane %v1449_v29, 4  ;;  %v4648_v39 = vld [vmem:[%s4737_s3] ss:$0 sm:$0xff] }
  0xaf   : > { %3308 = vmatmul.mubr.msk.bf16.gmra.mrb[8].mxu1 %vm554_vm3, %v3013_v7  ;;  %3393 = vmatprep.mubr.msk.bf16.mxu0 %vm554_vm3, %v3111_v33  ;;  %v2465_v7 = vrot.slane %v2463_v6, 4  ;;  %v1419_v26 = vrot.slane %v1418_v38, 4  ;;  %v1429_v15 = vrot.slane %v1428_v16, 4  ;;  %v1433_v62 = vrot.slane %v1431_v23, 5  ;;  %v4768_v33 = vld [vmem:[#allocation6_spill] sm:$0xff] }
  0xb0   : > { %3311 = vmatprep.mubr.msk.bf16.mxu1 %vm554_vm3, %v3014_v20  ;;  %v2457_v56 = vsel %vm3936_vm7, %v3105_v61, %v2456_v3  ;;  %v2460_v46 = vsel %vm3936_vm7, %v2458_v47, %v2459_v36  ;;  %v1442_v14 = vor.u32 %v1441_v18, %v1438_v53  ;;  %v2470_v43 = vrot.slane %v4358_v13, 5 }
  0xb1   : > { %v2464_v55 = vsel %vm3936_vm7, %v3106_v12, %v2463_v6  ;;  %v2467_v2 = vsel %vm3936_vm7, %v2465_v7, %v2466_v10  ;;  %v1452_v25 = vor.u32 %v1451_v30, %v1447_v22  ;;  %v1455_v21 = vshll.u32 %v4768_v33, 16 }
  0xb2   : > { %v1424_v24 = vsel %vm3781_vm4, %v1419_v26, %v1423_v17  ;;  %v1434_v5 = vsel %vm3781_vm4, %v1429_v15, %v1433_v62  ;;  %v3114_v0 = vcombine.low %v2457_v56, %v2460_v46  ;;  %v3115_v13 = vcombine.low %v2464_v55, %v2467_v2 }
  0xb3   : > { %v3107_v54 = vrot.slane %v2948_v40, 9  ;;  %v2472_v60 = vrot.slane %v2470_v43, 4  ;;  %v2473_v28 = vrot.slane %v4481_v31, 5  ;;  %v3031_v20 = vcombine.low %v1424_v24, %v1434_v5 }
  0xb4   : > { %v1443_v63 = vrot.slane %v1442_v14, 4  ;;  %v1453_v34 = vrot.slane %v1452_v25, 4  ;;  %v1457_v8 = vrot.slane %v1455_v21, 5 }
  0xb5   : > { %v2471_v48 = vsel %vm3936_vm7, %v3107_v54, %v2470_v43  ;;  %v2474_v44 = vsel %vm3936_vm7, %v2472_v60, %v2473_v28 }
  0xb6   : > { %3394 = vmatmul.mubr.msk.bf16.gmra.mrb[4].mxu0 %vm554_vm3, %v3112_v19  ;;  %v1448_v31 = vsel %vm3781_vm4, %v1443_v63, %v1447_v22  ;;  %v1458_v17 = vsel %vm3781_vm4, %v1453_v34, %v1457_v8  ;;  %v3116_v45 = vcombine.low %v2471_v48, %v2474_v44 }
  0xb7   : > { %3312 = vmatmul.mubr.msk.bf16.gmra.mrb[12].mxu1 %vm554_vm3, %v3015_v42  ;;  %3397 = vmatprep.mubr.msk.bf16.mxu0 %vm554_vm3, %v3113_v41  ;;  %v3032_v35 = vcombine.low %v1448_v31, %v1458_v17 }
  0xb8   : > { %3325 = vmatprep.mubr.msk.bf16.mxu1 %vm554_vm3, %v3029_v1 }
  0xbe   : > { %3398 = vmatmul.mubr.msk.bf16.gmra.mrb[8].mxu0 %vm554_vm3, %v3114_v0 }
  0xbf   : > { %3326 = vmatmul.mubr.msk.bf16.vlgmr.msra.gmra.mrb[8].mxu1 %vm554_vm3, %v4547_v4  ;;  %3401 = vmatprep.mubr.msk.bf16.mxu0 %vm554_vm3, %v3115_v13 }
  0xc0   : > { %3329 = vmatprep.mubr.msk.bf16.mxu1 %vm554_vm3, %v3031_v20 }
  0xc6   : > { %3402 = vmatmul.mubr.msk.bf16.gmra.mrb[12].mxu0 %vm554_vm3, %v3116_v45 }
  0xc7   : > { %3330 = vmatmul.mubr.msk.bf16.gmra.mrb[12].mxu1 %vm554_vm3, %v3032_v35 }
 0x172   : > { %v3301_v4 = vpop.f32.mrb[0].mxu1 }
 0x173   : > { %v1188_v42 = vpop.f32.mrb[1].mxu1 }
 0x174   : > { %v3302_v50 = vpop.f32.mrb[2].mxu1 }
 0x175   : > { %v1191_v49 = vpop.f32.mrb[3].mxu1 }
 0x17a   : > { %v3305_v37 = vpop.f32.mrb[4].mxu1 }
 0x17b   : > { %v1204_v11 = vpop.f32.mrb[5].mxu1 }
 0x17c   : > { %v3306_v59 = vpop.f32.mrb[6].mxu1 }
 0x17d   : > { %v1207_v51 = vpop.f32.mrb[7].mxu1 }
 0x181   : > { %v3391_v32 = vpop.f32.mrb[0].mxu0 }
 0x182   : > { %v3407_v9 = vadd.f32 %v3391_v32, %v3301_v4  ;;  %v2562_v3 = vpop.f32.mrb[1].mxu0 }
 0x183   : > { %v3408_v27 = vadd.f32 %v2562_v3, %v1188_v42  ;;  %v3392_v6 = vpop.f32.mrb[2].mxu0 }
 0x184   : > { %v2650_v58 = vmul.f32 %v3407_v9, %v4643_v52  ;;  %v3409_v29 = vadd.f32 %v3392_v6, %v3302_v50  ;;  %v2565_v53 = vpop.f32.mrb[3].mxu0 }
 0x185   : > { %v2648_v38 = vmul.f32 %v3408_v27, %v4643_v52  ;;  %v3410_v16 = vadd.f32 %v2565_v53, %v1191_v49 }
 0x186   : > { %v2673_v57 = vadd.f32 %v4648_v39, %v2650_v58  ;;  %v2651_v23 = vmul.f32 %v3409_v29, %v4643_v52 }
 0x187   : > { %v2671_v18 = vadd.f32 %v4648_v39, %v2648_v38  ;;  %v2649_v19 = vmul.f32 %v3410_v16, %v4643_v52 }
 0x188   : > { %v3148_v61 = vpack.c.bf16 %v2673_v57, %v2673_v57  ;;  %v2674_v36 = vadd.f32 %v4648_v39, %v2651_v23 }
 0x189   : > { %v3146_v1 = vpack.c.bf16 %v2671_v18, %v2671_v18  ;;  %v2672_v41 = vadd.f32 %v4648_v39, %v2649_v19  ;;  %v3395_v47 = vpop.f32.mrb[4].mxu0 }
 0x18a   : > { %2754 = vst.msk [vmem:[%s4657_s12 + $0x8] sm:$0xf] %vm2751_vm8, %v3148_v61  ;;  %v3149_v12 = vpack.c.bf16 %v2674_v36, %v2674_v36  ;;  %v3411_v7 = vadd.f32 %v3395_v47, %v3305_v37  ;;  %v2578_v10 = vpop.f32.mrb[5].mxu0 }
 0x18b   : > { %2752 = vst.msk [vmem:[%s4657_s12] sm:$0xf] %vm2751_vm8, %v3146_v1  ;;  %v3147_v22 = vpack.c.bf16 %v2672_v41, %v2672_v41  ;;  %v3412_v30 = vadd.f32 %v2578_v10, %v1204_v11  ;;  %v3396_v26 = vpop.f32.mrb[6].mxu0 }
 0x18c   : > { %2755 = vst.msk [vmem:[%s4657_s12 + $0xc] sm:$0xf] %vm2751_vm8, %v3149_v12  ;;  %v2654_v15 = vmul.f32 %v3411_v7, %v4643_v52  ;;  %v3413_v62 = vadd.f32 %v3396_v26, %v3306_v59  ;;  %v2581_v56 = vpop.f32.mrb[7].mxu0 }
 0x18d   : > { %2753 = vst.msk [vmem:[%s4657_s12 + $0x4] sm:$0xf] %vm2751_vm8, %v3147_v22  ;;  %v2652_v46 = vmul.f32 %v3412_v30, %v4643_v52  ;;  %v3414_v14 = vadd.f32 %v2581_v56, %v1207_v51 }
 0x18e   : > { %v2677_v43 = vadd.f32 %v4648_v39, %v2654_v15  ;;  %v2655_v55 = vmul.f32 %v3413_v62, %v4643_v52 }
 0x18f   : > { %v2675_v2 = vadd.f32 %v4648_v39, %v2652_v46  ;;  %v2653_v25 = vmul.f32 %v3414_v14, %v4643_v52 }
 0x190   : > { %v3152_v33 = vpack.c.bf16 %v2677_v43, %v2677_v43  ;;  %v2678_v21 = vadd.f32 %v4648_v39, %v2655_v55 }
 0x191   : > { %v3150_v40 = vpack.c.bf16 %v2675_v2, %v2675_v2  ;;  %v2676_v24 = vadd.f32 %v4648_v39, %v2653_v25  ;;  %v3399_v5 = vpop.f32.mrb[8].mxu0 }
 0x192   : > { %2758 = vst.msk [vmem:[%s4657_s12 + $0x18] sm:$0xf] %vm2751_vm8, %v3152_v33  ;;  %v3153_v0 = vpack.c.bf16 %v2678_v21, %v2678_v21  ;;  %v3327_v13 = vpop.f32.mrb[8].mxu1  ;;  %v2594_v54 = vpop.f32.mrb[9].mxu0 }
 0x193   : > { %2756 = vst.msk [vmem:[%s4657_s12 + $0x10] sm:$0xf] %vm2751_vm8, %v3150_v40  ;;  %v3151_v60 = vpack.c.bf16 %v2676_v24, %v2676_v24  ;;  %v3415_v28 = vadd.f32 %v3399_v5, %v3327_v13  ;;  %v1578_v20 = vpop.f32.mrb[9].mxu1  ;;  %v3400_v63 = vpop.f32.mrb[10].mxu0 }
 0x194   : > { %2759 = vst.msk [vmem:[%s4657_s12 + $0x1c] sm:$0xf] %vm2751_vm8, %v3153_v0  ;;  %v3416_v34 = vadd.f32 %v2594_v54, %v1578_v20  ;;  %v3328_v8 = vpop.f32.mrb[10].mxu1  ;;  %v2597_v48 = vpop.f32.mrb[11].mxu0 }
 0x195   : > { %2757 = vst.msk [vmem:[%s4657_s12 + $0x14] sm:$0xf] %vm2751_vm8, %v3151_v60  ;;  %v2658_v44 = vmul.f32 %v3415_v28, %v4643_v52  ;;  %v3417_v31 = vadd.f32 %v3400_v63, %v3328_v8  ;;  %v1581_v17 = vpop.f32.mrb[11].mxu1 }
 0x196   : > { %v2656_v45 = vmul.f32 %v3416_v34, %v4643_v52  ;;  %v3418_v35 = vadd.f32 %v2597_v48, %v1581_v17 }
 0x197   : > { %v2681_v4 = vadd.f32 %v4648_v39, %v2658_v44  ;;  %v2659_v42 = vmul.f32 %v3417_v31, %v4643_v52 }
 0x198   : > { %v2679_v50 = vadd.f32 %v4648_v39, %v2656_v45  ;;  %v2657_v49 = vmul.f32 %v3418_v35, %v4643_v52 }
 0x199   : > { %v3156_v37 = vpack.c.bf16 %v2681_v4, %v2681_v4  ;;  %v2682_v11 = vadd.f32 %v4648_v39, %v2659_v42  ;;  %v3403_v59 = vpop.f32.mrb[12].mxu0 }
 0x19a   : > { %v3154_v51 = vpack.c.bf16 %v2679_v50, %v2679_v50  ;;  %v2680_v32 = vadd.f32 %v4648_v39, %v2657_v49  ;;  %v3331_v9 = vpop.f32.mrb[12].mxu1  ;;  %v2610_v3 = vpop.f32.mrb[13].mxu0 }
 0x19b   : > { %2762 = vst.msk [vmem:[%s4657_s12 + $0x28] sm:$0xf] %vm2751_vm8, %v3156_v37  ;;  %v3157_v27 = vpack.c.bf16 %v2682_v11, %v2682_v11  ;;  %v3419_v6 = vadd.f32 %v3403_v59, %v3331_v9  ;;  %v1594_v58 = vpop.f32.mrb[13].mxu1  ;;  %v3404_v29 = vpop.f32.mrb[14].mxu0 }
 0x19c   : > { %2760 = vst.msk [vmem:[%s4657_s12 + $0x20] sm:$0xf] %vm2751_vm8, %v3154_v51  ;;  %v3155_v53 = vpack.c.bf16 %v2680_v32, %v2680_v32  ;;  %v3420_v38 = vadd.f32 %v2610_v3, %v1594_v58  ;;  %v3332_v16 = vpop.f32.mrb[14].mxu1  ;;  %v2613_v57 = vpop.f32.mrb[15].mxu0 }
 0x19d   : > { %2763 = vst.msk [vmem:[%s4657_s12 + $0x2c] sm:$0xf] %vm2751_vm8, %v3157_v27  ;;  %v2662_v23 = vmul.f32 %v3419_v6, %v4643_v52  ;;  %v3421_v18 = vadd.f32 %v3404_v29, %v3332_v16  ;;  %v1597_v19 = vpop.f32.mrb[15].mxu1 }
 0x19e   : > { %2761 = vst.msk [vmem:[%s4657_s12 + $0x24] sm:$0xf] %vm2751_vm8, %v3155_v53  ;;  %v2660_v61 = vmul.f32 %v3420_v38, %v4643_v52  ;;  %v3422_v36 = vadd.f32 %v2613_v57, %v1597_v19 }
 0x19f   : > { %v2685_v1 = vadd.f32 %v4648_v39, %v2662_v23  ;;  %v2663_v41 = vmul.f32 %v3421_v18, %v4643_v52 }
 0x1a0   : > { %v2683_v47 = vadd.f32 %v4648_v39, %v2660_v61  ;;  %v2661_v12 = vmul.f32 %v3422_v36, %v4643_v52 }
 0x1a1   : > { %v3160_v7 = vpack.c.bf16 %v2685_v1, %v2685_v1  ;;  %v2686_v10 = vadd.f32 %v4648_v39, %v2663_v41 }
 0x1a2   : > { %v3158_v22 = vpack.c.bf16 %v2683_v47, %v2683_v47  ;;  %v2684_v30 = vadd.f32 %v4648_v39, %v2661_v12 }
 0x1a3   : > { %2766 = vst.msk [vmem:[%s4657_s12 + $0x38] sm:$0xf] %vm2751_vm8, %v3160_v7  ;;  %v3161_v26 = vpack.c.bf16 %v2686_v10, %v2686_v10 }
 0x1a4   : > { %2764 = vst.msk [vmem:[%s4657_s12 + $0x30] sm:$0xf] %vm2751_vm8, %v3158_v22  ;;  %v3159_v15 = vpack.c.bf16 %v2684_v30, %v2684_v30 }
 0x1a5   : > { %2767 = vst.msk [vmem:[%s4657_s12 + $0x3c] sm:$0xf] %vm2751_vm8, %v3161_v26 }
 0x1a6   : > { %2765 = vst.msk [vmem:[%s4657_s12 + $0x34] sm:$0xf] %vm2751_vm8, %v3159_v15 }
 0x1a7 PF: > { %s14_s19 = sadd.s32 1, %s3657_s19   ;;  %s4769_s15 = smov %s3649_s17 }
 0x1a8   : > { %p11_p7 = scmp.ge.s32.totalorder %s14_s19, 6   ;;  %s4770_s16 = smov %s3653_s18 }
 0x1a9   : > { %s4771_s17 = smov %s4774_s20  ;;  %s4772_s18 = smov %s4778_s21 }
 0x1aa   :  { %13 = sbr.rel (!%p11_p7) target bundleno = 3 (0x3), region = 77 }

</bundles_post_ra>
